<compile_context>
chip_gen: v6e
topology: v6e:2x2x1
jax: 0.10.0
libtpu: 0.0.40
codegen_flags: <defaults>
</compile_context>

<pallas_src>
import functools

import jax
import jax.numpy as jnp
from jax.experimental import pallas as pl
from jax.experimental.pallas import tpu as pltpu


def _merge_kernel(x_ref, w0_ref, w1_ref, g_ref, b_ref, o_ref, *, eps):
    """Fused 2x2 patch gather + Linear(4C->2C) + LayerNorm(2C).

    x_ref : (tbh, 2, W2, 2C)  one contiguous HBM slab per grid step
    w0/w1 : (2C, 2C)          row-permuted halves of the (4C, 2C) reduction weight
    g/b   : (1, 2C)           LayerNorm affine (f32)
    o_ref : (tbh*W2, 2C)
    """
    tm, _ = o_ref.shape
    c_in2 = x_ref.shape[-1]

    x = x_ref[...]                                  # (tbh, 2, W2, 2C)
    # Parity split along the outer dim 1 is cheap; the (tbh, W2) flatten is
    # layout-free when W2 % 8 == 0 (true in the self-test).
    # TODO(synk): for Swin stages with W2 % 8 != 0 (28/14/7) this flatten is a
    # VMEM-local sublane repack; a 3-D dot_general formulation would avoid it.
    xe = x[:, 0].reshape(tm, c_in2)                 # h-even rows: [x0 | x2] channels
    xo = x[:, 1].reshape(tm, c_in2)                 # h-odd  rows: [x1 | x3] channels

    # concat([x0,x1,x2,x3], -1) @ W  ==  xe @ W0 + xo @ W1, accumulated in f32.
    # (A lane-concat to one K=4C dot would need an XLU concat; not worth it in
    # this HBM-bound regime.)
    y = jnp.dot(xe, w0_ref[...], preferred_element_type=jnp.float32)
    y = y + jnp.dot(xo, w1_ref[...], preferred_element_type=jnp.float32)

    # LayerNorm over channels (biased variance, like torch.nn.LayerNorm), two-pass
    # in f32 for robustness.  Note: factoring scale/shift does NOT reduce wide VPU
    # ops here (gamma is per-channel, mean/var per-row, so any combination is
    # already full-width); the form below is the minimal 5 wide ops.
    mean = jnp.mean(y, axis=-1, keepdims=True)
    yc = y - mean
    var = jnp.mean(yc * yc, axis=-1, keepdims=True)
    yn = yc * jax.lax.rsqrt(var + eps)
    o_ref[...] = (yn * g_ref[...] + b_ref[...]).astype(o_ref.dtype)


def _round_down8(v):
    return max(8, (int(v) // 8) * 8)


def _num_tensorcores():
    """Best-effort TensorCore count per chip (v5e/v6e: 1, v4/v5p/v7x: 2)."""
    try:
        info = pltpu.get_tpu_info()
        for name in ("num_cores", "core_count", "num_tensorcores", "tensorcore_count"):
            v = getattr(info, name, None)
            if isinstance(v, int) and 0 < v <= 8:
                return v
    except Exception:
        pass
    try:
        d = jax.devices()[0]
        v = getattr(d, "num_cores", None)
        if isinstance(v, int) and 0 < v <= 8:
            return v
        kind = str(getattr(d, "device_kind", "")).lower()
        if any(t in kind for t in ("v4", "v5p", "v7")):
            return 2
    except Exception:
        pass
    return 1


def _select_tbh(bh, w2, per_row_bytes, fixed_bytes, vmem_budget, n_cores, target_rows):
    """Image row-pairs per grid step (first block dim).

    Multiple of 8, sized against the VMEM budget, large enough to amortize the
    ~0.35us/step overhead, small enough that the pipeline has >=2 steps (and
    ~3 steps per TensorCore on 2-TC parts) to overlap DMA with compute.
    """
    w2 = max(int(w2), 1)
    bh = int(bh)

    # Start from the target number of output rows per step.
    tbh = _round_down8(max(8, target_rows // w2))

    # VMEM cap (per_row_bytes models the full per-row-pair footprint).
    if per_row_bytes > 0:
        tbh = min(tbh, _round_down8((vmem_budget - fixed_bytes) // per_row_bytes))

    # Keep enough grid steps for prefetch/writeback overlap, but never shrink a
    # tile below ~512 output rows just to create more steps.
    min_steps = 2 if n_cores <= 1 else 3 * n_cores
    min_tbh = _round_down8(-(-512 // w2))
    tbh_for_steps = (bh // min_steps // 8) * 8
    if tbh_for_steps >= min_tbh:
        tbh = min(tbh, tbh_for_steps)

    if tbh >= bh:
        return bh                       # tiny input: single full block
    return max(tbh, 8)


def prepare_patch_merging_params(w_reduction, gamma, beta, compute_dtype=jnp.float32):
    """Hoisted once-per-layer parameter prep (kept off the per-call path).

    w_reduction: (4C, 2C) = torch `reduction.weight.T`; gamma/beta: (2C,).
    Returns (w0, w1, g2, b2): the weight is split/permuted so each row-parity
    slab multiplies a contiguous (2C, 2C) block.
    torch.cat channel order: x0=(h ev,w ev), x1=(h od,w ev), x2=(h ev,w od), x3=(h od,w od).
    """
    c4, c_out = w_reduction.shape
    C = c4 // 4
    w = w_reduction
    w0 = jnp.concatenate([w[0:C], w[2 * C:3 * C]], axis=0).astype(compute_dtype)      # h-even slab
    w1 = jnp.concatenate([w[C:2 * C], w[3 * C:4 * C]], axis=0).astype(compute_dtype)  # h-odd slab
    g2 = gamma.reshape(1, c_out).astype(jnp.float32)
    b2 = beta.reshape(1, c_out).astype(jnp.float32)
    return w0, w1, g2, b2


def patch_merging_pallas(x, params, input_resolution, *, eps=1e-5, row_tile=None):
    """x: (B, L, C); params from prepare_patch_merging_params; returns (B, L//4, 2C)."""
    H, W = input_resolution
    B, L, C = x.shape
    assert L == H * W, "input feature has wrong size"
    assert H % 2 == 0 and W % 2 == 0, f"x size ({H}*{W}) are not even."

    H2, W2 = H // 2, W // 2
    L4 = H2 * W2
    BH = B * H2
    c_in2 = 2 * C
    c_out = 2 * C

    w0, w1, g2, b2 = params
    assert w0.shape == (c_in2, c_out) and w1.shape == (c_in2, c_out)
    if w0.dtype != x.dtype:
        w0 = w0.astype(x.dtype)
    if w1.dtype != x.dtype:
        w1 = w1.astype(x.dtype)

    # Metadata-only view: (B, L, C) -> (B*H2, 2, W2, 2C).
    #   index (b*H2+h2, ph, w2, pw*C + c)  <->  x[b, (2*h2+ph)*W + 2*w2 + pw, c]
    x_r = x.reshape(BH, 2, W2, c_in2)

    # ---- VMEM-aware tile sizing (includes in-kernel f32 temporaries) ----------
    itemsize = jnp.dtype(x.dtype).itemsize
    in_row = 2 * W2 * c_in2 * itemsize                # one (2, W2, 2C) row-pair slab
    out_row = W2 * c_out * itemsize
    tmp_row = 3 * W2 * c_out * 4 + 2 * in_row         # f32 y / centered / sq + parity copies
    per_row = 2 * in_row + 2 * out_row + tmp_row      # double-buffered I/O + live temps
    fixed = (2 * (2 * c_in2 * c_out * itemsize        # w0+w1 (counted x2, conservative)
                  + 2 * c_out * 4)                    # gamma+beta (f32)
             + (2 << 20))                             # compiler-internal slack
    try:
        vmem_cap = int(getattr(pltpu.get_tpu_info(), "vmem_capacity_bytes", 64 << 20))
    except Exception:
        vmem_cap = 64 << 20                           # conservative v7x per-core floor

    n_cores = _num_tensorcores()
    target_rows = int(row_tile) if row_tile is not None else (1024 if n_cores >= 2 else 2048)
    tbh = _select_tbh(BH, W2, per_row, fixed, int(vmem_cap * 0.8), n_cores, target_rows)
    grid = pl.cdiv(BH, tbh)
    needed = fixed + per_row * tbh + (2 << 20)
    vmem_limit = int(min(int(vmem_cap * 0.9), max(needed, 32 << 20)))

    kernel = functools.partial(_merge_kernel, eps=eps)

    def _run(resident_consts):
        if resident_consts:
            # Whole-array, single-buffered VMEM residents: fetched once, never
            # re-DMA'd across grid steps, no second pipeline buffer.
            const_specs = [pl.BlockSpec(memory_space=pltpu.MemorySpace.VMEM)] * 4
        else:
            # Proven fallback: constant-index pipelined blocks (no per-step
            # re-fetch, but one extra buffer per constant).
            const_specs = [
                pl.BlockSpec((c_in2, c_out), lambda i: (0, 0)),
                pl.BlockSpec((c_in2, c_out), lambda i: (0, 0)),
                pl.BlockSpec((1, c_out), lambda i: (0, 0)),
                pl.BlockSpec((1, c_out), lambda i: (0, 0)),
            ]
        return pl.pallas_call(
            kernel,
            out_shape=jax.ShapeDtypeStruct((BH * W2, c_out), x.dtype),
            grid_spec=pltpu.PrefetchScalarGridSpec(
                num_scalar_prefetch=0,
                grid=(grid,),
                in_specs=[
                    # One contiguous (tbh, 2, W2, 2C) slab per step: a single
                    # linear HBM DMA covering both row parities.
                    pl.BlockSpec((tbh, 2, W2, c_in2), lambda i: (i, 0, 0, 0)),
                ] + const_specs,
                # NOTE: for C < 64 (toy sizes) c_out < 128 so stores are masked
                # vst.msk; acceptable here, and padding would add HBM traffic
                # for the production (mem-bound) sizes.
                out_specs=pl.BlockSpec((tbh * W2, c_out), lambda i: (i, 0)),
            ),
            compiler_params=pltpu.CompilerParams(
                dimension_semantics=("parallel",),
                vmem_limit_bytes=vmem_limit),
        )(x_r, w0, w1, g2, b2)

    try:
        out = _run(True)
    except Exception:   # fall back to the proven constant-index spec form
        out = _run(False)

    # Partial last tile: padded rows may compute LayerNorm on garbage before being
    # clipped on writeback -- benign (never leaks into valid rows).
    return out.reshape(B, L4, c_out)


def patch_merging(x, w_reduction, gamma, beta, input_resolution, *, eps=1e-5, row_tile=None):
    """Convenience wrapper (does the param prep inline)."""
    params = prepare_patch_merging_params(w_reduction, gamma, beta, x.dtype)
    return patch_merging_pallas(x, params, input_resolution, eps=eps, row_tile=row_tile)


def patch_merging_ref(x, w_reduction, gamma, beta, input_resolution, eps=1e-5):
    """Pure-JAX reference mirroring the PyTorch forward."""
    H, W = input_resolution
    B, L, C = x.shape
    x4 = x.reshape(B, H, W, C)
    x0 = x4[:, 0::2, 0::2, :]
    x1 = x4[:, 1::2, 0::2, :]
    x2 = x4[:, 0::2, 1::2, :]
    x3 = x4[:, 1::2, 1::2, :]
    xm = jnp.concatenate([x0, x1, x2, x3], axis=-1).reshape(B, -1, 4 * C)
    y = jnp.einsum("blc,cd->bld", xm.astype(jnp.float32),
                   w_reduction.astype(jnp.float32))
    mean = jnp.mean(y, axis=-1, keepdims=True)
    var = jnp.mean(jnp.square(y - mean), axis=-1, keepdims=True)
    y = (y - mean) * jax.lax.rsqrt(var + eps)
    return (y * gamma + beta).astype(x.dtype)


if __name__ == "__main__":
    # Small, even resolution consistent with the module: H=W=16, dim C=32.
    B, H, W, C = 2, 16, 16, 32
    L = H * W

    key = jax.random.PRNGKey(0)
    kx, kw, kg, kb = jax.random.split(key, 4)

    x = jax.random.normal(kx, (B, L, C), dtype=jnp.float32)
    # nn.Linear(4C, 2C, bias=False): torch weight is (2C, 4C); we store its
    # transpose (4C, 2C) so y = x @ W.
    w_reduction = (jax.random.normal(kw, (4 * C, 2 * C), dtype=jnp.float32)
                   * (1.0 / jnp.sqrt(4.0 * C)))
    gamma = 1.0 + 0.1 * jax.random.normal(kg, (2 * C,), dtype=jnp.float32)
    beta = 0.1 * jax.random.normal(kb, (2 * C,), dtype=jnp.float32)

    ref = patch_merging_ref(x, w_reduction, gamma, beta, (H, W))

    # f32 path (strict check); params prepared once, hoisted off the call path.
    params_f32 = prepare_patch_merging_params(w_reduction, gamma, beta, jnp.float32)
    out = patch_merging_pallas(x, params_f32, (H, W))
    out = jax.block_until_ready(out)
    assert out.shape == (B, L // 4, 2 * C), out.shape
    assert jnp.allclose(out, ref, atol=2e-4, rtol=2e-4), \
        float(jnp.max(jnp.abs(out - ref)))

    # bf16 path: weights are deliberately pre-cast to bf16 (native MXU dtype,
    # halves HBM traffic) with f32 accumulation in-kernel -- documented choice,
    # hence the loose tolerance vs the f32 reference.
    params_bf16 = prepare_patch_merging_params(w_reduction, gamma, beta, jnp.bfloat16)
    out_b = patch_merging_pallas(x.astype(jnp.bfloat16), params_bf16, (H, W))
    out_b = jax.block_until_ready(out_b)
    err_b = float(jnp.max(jnp.abs(out_b.astype(jnp.float32) - ref)))
    assert err_b < 1.5e-1, err_b

    print("KERNEL_OK")
</pallas_src>

<mosaic_0001>
module attributes {stable_mosaic.version = 11 : i64} {
  func.func @_merge_kernel(%arg0: i32, %arg1: memref<16x2x8x64xf32, #tpu.memory_space<vmem>>, %arg2: memref<64x64xf32, #tpu.memory_space<vmem>>, %arg3: memref<64x64xf32, #tpu.memory_space<vmem>>, %arg4: memref<1x64xf32, #tpu.memory_space<vmem>>, %arg5: memref<1x64xf32, #tpu.memory_space<vmem>>, %arg6: memref<128x64xf32, #tpu.memory_space<vmem>>) attributes {dimension_semantics = [#tpu.dimension_semantics<parallel>], iteration_bounds = array<i64: 1>, scalar_prefetch = 0 : i64, scratch_operands = 0 : i64, tpu.core_type = #tpu.core_type<tc>, window_params = [{transform_indices = @transform_0, window_bounds = array<i64: 16, 2, 8, 64>}, {pipeline_mode = #tpu.pipeline_mode<synchronous>, transform_indices = @transform_1, window_bounds = array<i64: 64, 64>}, {pipeline_mode = #tpu.pipeline_mode<synchronous>, transform_indices = @transform_2, window_bounds = array<i64: 64, 64>}, {pipeline_mode = #tpu.pipeline_mode<synchronous>, transform_indices = @transform_3, window_bounds = array<i64: 1, 64>}, {pipeline_mode = #tpu.pipeline_mode<synchronous>, transform_indices = @transform_4, window_bounds = array<i64: 1, 64>}, {transform_indices = @transform_5, window_bounds = array<i64: 128, 64>}]} {
    %c0 = arith.constant 0 : index
    %c0_0 = arith.constant 0 : index
    %c0_1 = arith.constant 0 : index
    %c0_2 = arith.constant 0 : index
    %0 = vector.load %arg1[%c0, %c0_0, %c0_1, %c0_2] : memref<16x2x8x64xf32, #tpu.memory_space<vmem>>, vector<16x2x8x64xf32>
    %1 = vector.extract_strided_slice %0 {offsets = [0, 0, 0, 0], sizes = [16, 1, 8, 64], strides = [1, 1, 1, 1]} : vector<16x2x8x64xf32> to vector<16x1x8x64xf32>
    %2 = vector.shape_cast %1 : vector<16x1x8x64xf32> to vector<16x8x64xf32>
    %3 = vector.shape_cast %2 : vector<16x8x64xf32> to vector<128x64xf32>
    %4 = vector.extract_strided_slice %0 {offsets = [0, 1, 0, 0], sizes = [16, 1, 8, 64], strides = [1, 1, 1, 1]} : vector<16x2x8x64xf32> to vector<16x1x8x64xf32>
    %5 = vector.shape_cast %4 : vector<16x1x8x64xf32> to vector<16x8x64xf32>
    %6 = vector.shape_cast %5 : vector<16x8x64xf32> to vector<128x64xf32>
    %c0_3 = arith.constant 0 : index
    %c0_4 = arith.constant 0 : index
    %7 = vector.load %arg2[%c0_3, %c0_4] : memref<64x64xf32, #tpu.memory_space<vmem>>, vector<64x64xf32>
    %cst = arith.constant dense<0.000000e+00> : vector<128x64xf32>
    %8 = tpu.matmul %3, %7, %cst {dimension_numbers = #tpu.dot_dimension_numbers<[1], [0], [0], [1], [0, 0, 1, 1], [], []>} : vector<128x64xf32>, vector<64x64xf32>, vector<128x64xf32> -> vector<128x64xf32>
    %c0_5 = arith.constant 0 : index
    %c0_6 = arith.constant 0 : index
    %9 = vector.load %arg3[%c0_5, %c0_6] : memref<64x64xf32, #tpu.memory_space<vmem>>, vector<64x64xf32>
    %cst_7 = arith.constant dense<0.000000e+00> : vector<128x64xf32>
    %10 = tpu.matmul %6, %9, %cst_7 {dimension_numbers = #tpu.dot_dimension_numbers<[1], [0], [0], [1], [0, 0, 1, 1], [], []>} : vector<128x64xf32>, vector<64x64xf32>, vector<128x64xf32> -> vector<128x64xf32>
    %11 = arith.addf %8, %10 : vector<128x64xf32>
    %cst_8 = arith.constant dense<0.000000e+00> : vector<128xf32>
    %12 = vector.multi_reduction <add>, %11, %cst_8 [1] : vector<128x64xf32> to vector<128xf32>
    %13 = vector.shape_cast %12 : vector<128xf32> to vector<128x1xf32>
    %cst_9 = arith.constant 6.400000e+01 : f32
    %14 = vector.broadcast %cst_9 : f32 to vector<128x1xf32>
    %15 = arith.divf %13, %14 : vector<128x1xf32>
    %16 = vector.broadcast %15 : vector<128x1xf32> to vector<128x64xf32>
    %17 = arith.subf %11, %16 : vector<128x64xf32>
    %18 = arith.mulf %17, %17 : vector<128x64xf32>
    %cst_10 = arith.constant dense<0.000000e+00> : vector<128xf32>
    %19 = vector.multi_reduction <add>, %18, %cst_10 [1] : vector<128x64xf32> to vector<128xf32>
    %20 = vector.shape_cast %19 : vector<128xf32> to vector<128x1xf32>
    %cst_11 = arith.constant 6.400000e+01 : f32
    %21 = vector.broadcast %cst_11 : f32 to vector<128x1xf32>
    %22 = arith.divf %20, %21 : vector<128x1xf32>
    %cst_12 = arith.constant 9.99999974E-6 : f32
    %23 = vector.broadcast %cst_12 : f32 to vector<128x1xf32>
    %24 = arith.addf %22, %23 : vector<128x1xf32>
    %25 = math.rsqrt %24 : vector<128x1xf32>
    %26 = vector.broadcast %25 : vector<128x1xf32> to vector<128x64xf32>
    %27 = arith.mulf %17, %26 : vector<128x64xf32>
    %c0_13 = arith.constant 0 : index
    %c0_14 = arith.constant 0 : index
    %28 = vector.load %arg4[%c0_13, %c0_14] : memref<1x64xf32, #tpu.memory_space<vmem>>, vector<1x64xf32>
    %29 = vector.broadcast %28 : vector<1x64xf32> to vector<128x64xf32>
    %30 = arith.mulf %27, %29 : vector<128x64xf32>
    %c0_15 = arith.constant 0 : index
    %c0_16 = arith.constant 0 : index
    %31 = vector.load %arg5[%c0_15, %c0_16] : memref<1x64xf32, #tpu.memory_space<vmem>>, vector<1x64xf32>
    %32 = vector.broadcast %31 : vector<1x64xf32> to vector<128x64xf32>
    %33 = arith.addf %30, %32 : vector<128x64xf32>
    %c0_17 = arith.constant 0 : index
    %c0_18 = arith.constant 0 : index
    %34 = vector.load %arg6[%c0_17, %c0_18] : memref<128x64xf32, #tpu.memory_space<vmem>>, vector<128x64xf32>
    tpu.vector_store %arg6[%c0_17, %c0_18], %33 {strides = array<i32>} : memref<128x64xf32, #tpu.memory_space<vmem>>, vector<128x64xf32>,
    return
  }
  func.func @transform_0(%arg0: i32) -> (i32, i32, i32, i32) {
    %c0_i32 = arith.constant 0 : i32
    %c0_i32_0 = arith.constant 0 : i32
    %c0_i32_1 = arith.constant 0 : i32
    %c0_i32_2 = arith.constant 0 : i32
    return %arg0, %c0_i32, %c0_i32_0, %c0_i32_1 : i32, i32, i32, i32
  }
  func.func @transform_1(%arg0: i32) -> (i32, i32) {
    %c0_i32 = arith.constant 0 : i32
    %c0_i32_0 = arith.constant 0 : i32
    %c0_i32_1 = arith.constant 0 : i32
    return %c0_i32, %c0_i32_0 : i32, i32
  }
  func.func @transform_2(%arg0: i32) -> (i32, i32) {
    %c0_i32 = arith.constant 0 : i32
    %c0_i32_0 = arith.constant 0 : i32
    %c0_i32_1 = arith.constant 0 : i32
    return %c0_i32, %c0_i32_0 : i32, i32
  }
  func.func @transform_3(%arg0: i32) -> (i32, i32) {
    %c0_i32 = arith.constant 0 : i32
    %c0_i32_0 = arith.constant 0 : i32
    %c0_i32_1 = arith.constant 0 : i32
    return %c0_i32, %c0_i32_0 : i32, i32
  }
  func.func @transform_4(%arg0: i32) -> (i32, i32) {
    %c0_i32 = arith.constant 0 : i32
    %c0_i32_0 = arith.constant 0 : i32
    %c0_i32_1 = arith.constant 0 : i32
    return %c0_i32, %c0_i32_0 : i32, i32
  }
  func.func @transform_5(%arg0: i32) -> (i32, i32) {
    %c0_i32 = arith.constant 0 : i32
    %c0_i32_0 = arith.constant 0 : i32
    return %arg0, %c0_i32 : i32, i32
  }
}

module attributes {stable_mosaic.version = 11 : i64} {
  func.func @_merge_kernel(%arg0: i32, %arg1: memref<16x2x8x64xf32, #tpu.memory_space<vmem>>, %arg2: memref<64x64xf32, #tpu.memory_space<vmem>>, %arg3: memref<64x64xf32, #tpu.memory_space<vmem>>, %arg4: memref<1x64xf32, #tpu.memory_space<vmem>>, %arg5: memref<1x64xf32, #tpu.memory_space<vmem>>, %arg6: memref<128x64xf32, #tpu.memory_space<vmem>>) attributes {dimension_semantics = [#tpu.dimension_semantics<parallel>], iteration_bounds = array<i64: 1>, scalar_prefetch = 0 : i64, scratch_operands = 0 : i64, tpu.core_type = #tpu.core_type<tc>, window_params = [{transform_indices = @transform_0, window_bounds = array<i64: 16, 2, 8, 64>}, {pipeline_mode = #tpu.pipeline_mode<synchronous>, transform_indices = @transform_1, window_bounds = array<i64: 64, 64>}, {pipeline_mode = #tpu.pipeline_mode<synchronous>, transform_indices = @transform_2, window_bounds = array<i64: 64, 64>}, {pipeline_mode = #tpu.pipeline_mode<synchronous>, transform_indices = @transform_3, window_bounds = array<i64: 1, 64>}, {pipeline_mode = #tpu.pipeline_mode<synchronous>, transform_indices = @transform_4, window_bounds = array<i64: 1, 64>}, {transform_indices = @transform_5, window_bounds = array<i64: 128, 64>}]} {
    %c0 = arith.constant 0 : index
    %c0_0 = arith.constant 0 : index
    %c0_1 = arith.constant 0 : index
    %c0_2 = arith.constant 0 : index
    %0 = vector.load %arg1[%c0, %c0_0, %c0_1, %c0_2] : memref<16x2x8x64xf32, #tpu.memory_space<vmem>>, vector<16x2x8x64xf32>
    %1 = vector.extract_strided_slice %0 {offsets = [0, 0, 0, 0], sizes = [16, 1, 8, 64], strides = [1, 1, 1, 1]} : vector<16x2x8x64xf32> to vector<16x1x8x64xf32>
    %2 = vector.shape_cast %1 : vector<16x1x8x64xf32> to vector<16x8x64xf32>
    %3 = vector.shape_cast %2 : vector<16x8x64xf32> to vector<128x64xf32>
    %4 = vector.extract_strided_slice %0 {offsets = [0, 1, 0, 0], sizes = [16, 1, 8, 64], strides = [1, 1, 1, 1]} : vector<16x2x8x64xf32> to vector<16x1x8x64xf32>
    %5 = vector.shape_cast %4 : vector<16x1x8x64xf32> to vector<16x8x64xf32>
    %6 = vector.shape_cast %5 : vector<16x8x64xf32> to vector<128x64xf32>
    %c0_3 = arith.constant 0 : index
    %c0_4 = arith.constant 0 : index
    %7 = vector.load %arg2[%c0_3, %c0_4] : memref<64x64xf32, #tpu.memory_space<vmem>>, vector<64x64xf32>
    %cst = arith.constant dense<0.000000e+00> : vector<128x64xf32>
    %8 = tpu.matmul %3, %7, %cst {dimension_numbers = #tpu.dot_dimension_numbers<[1], [0], [0], [1], [0, 0, 1, 1], [], []>} : vector<128x64xf32>, vector<64x64xf32>, vector<128x64xf32> -> vector<128x64xf32>
    %c0_5 = arith.constant 0 : index
    %c0_6 = arith.constant 0 : index
    %9 = vector.load %arg3[%c0_5, %c0_6] : memref<64x64xf32, #tpu.memory_space<vmem>>, vector<64x64xf32>
    %cst_7 = arith.constant dense<0.000000e+00> : vector<128x64xf32>
    %10 = tpu.matmul %6, %9, %cst_7 {dimension_numbers = #tpu.dot_dimension_numbers<[1], [0], [0], [1], [0, 0, 1, 1], [], []>} : vector<128x64xf32>, vector<64x64xf32>, vector<128x64xf32> -> vector<128x64xf32>
    %11 = arith.addf %8, %10 : vector<128x64xf32>
    %cst_8 = arith.constant dense<0.000000e+00> : vector<128xf32>
    %12 = vector.multi_reduction <add>, %11, %cst_8 [1] : vector<128x64xf32> to vector<128xf32>
    %13 = vector.shape_cast %12 : vector<128xf32> to vector<128x1xf32>
    %cst_9 = arith.constant 6.400000e+01 : f32
    %14 = vector.broadcast %cst_9 : f32 to vector<128x1xf32>
    %15 = arith.divf %13, %14 : vector<128x1xf32>
    %16 = vector.broadcast %15 : vector<128x1xf32> to vector<128x64xf32>
    %17 = arith.subf %11, %16 : vector<128x64xf32>
    %18 = arith.mulf %17, %17 : vector<128x64xf32>
    %cst_10 = arith.constant dense<0.000000e+00> : vector<128xf32>
    %19 = vector.multi_reduction <add>, %18, %cst_10 [1] : vector<128x64xf32> to vector<128xf32>
    %20 = vector.shape_cast %19 : vector<128xf32> to vector<128x1xf32>
    %cst_11 = arith.constant 6.400000e+01 : f32
    %21 = vector.broadcast %cst_11 : f32 to vector<128x1xf32>
    %22 = arith.divf %20, %21 : vector<128x1xf32>
    %cst_12 = arith.constant 9.99999974E-6 : f32
    %23 = vector.broadcast %cst_12 : f32 to vector<128x1xf32>
    %24 = arith.addf %22, %23 : vector<128x1xf32>
    %25 = math.rsqrt %24 : vector<128x1xf32>
    %26 = vector.broadcast %25 : vector<128x1xf32> to vector<128x64xf32>
    %27 = arith.mulf %17, %26 : vector<128x64xf32>
    %c0_13 = arith.constant 0 : index
    %c0_14 = arith.constant 0 : index
    %28 = vector.load %arg4[%c0_13, %c0_14] : memref<1x64xf32, #tpu.memory_space<vmem>>, vector<1x64xf32>
    %29 = vector.broadcast %28 : vector<1x64xf32> to vector<128x64xf32>
    %30 = arith.mulf %27, %29 : vector<128x64xf32>
    %c0_15 = arith.constant 0 : index
    %c0_16 = arith.constant 0 : index
    %31 = vector.load %arg5[%c0_15, %c0_16] : memref<1x64xf32, #tpu.memory_space<vmem>>, vector<1x64xf32>
    %32 = vector.broadcast %31 : vector<1x64xf32> to vector<128x64xf32>
    %33 = arith.addf %30, %32 : vector<128x64xf32>
    %c0_17 = arith.constant 0 : index
    %c0_18 = arith.constant 0 : index
    %34 = vector.load %arg6[%c0_17, %c0_18] : memref<128x64xf32, #tpu.memory_space<vmem>>, vector<128x64xf32>
    tpu.vector_store %arg6[%c0_17, %c0_18], %33 {strides = array<i32>} : memref<128x64xf32, #tpu.memory_space<vmem>>, vector<128x64xf32>,
    return
  }
  func.func @transform_0(%arg0: i32) -> (i32, i32, i32, i32) {
    %c0_i32 = arith.constant 0 : i32
    %c0_i32_0 = arith.constant 0 : i32
    %c0_i32_1 = arith.constant 0 : i32
    %c0_i32_2 = arith.constant 0 : i32
    return %arg0, %c0_i32, %c0_i32_0, %c0_i32_1 : i32, i32, i32, i32
  }
  func.func @transform_1(%arg0: i32) -> (i32, i32) {
    %c0_i32 = arith.constant 0 : i32
    %c0_i32_0 = arith.constant 0 : i32
    %c0_i32_1 = arith.constant 0 : i32
    return %c0_i32, %c0_i32_0 : i32, i32
  }
  func.func @transform_2(%arg0: i32) -> (i32, i32) {
    %c0_i32 = arith.constant 0 : i32
    %c0_i32_0 = arith.constant 0 : i32
    %c0_i32_1 = arith.constant 0 : i32
    return %c0_i32, %c0_i32_0 : i32, i32
  }
  func.func @transform_3(%arg0: i32) -> (i32, i32) {
    %c0_i32 = arith.constant 0 : i32
    %c0_i32_0 = arith.constant 0 : i32
    %c0_i32_1 = arith.constant 0 : i32
    return %c0_i32, %c0_i32_0 : i32, i32
  }
  func.func @transform_4(%arg0: i32) -> (i32, i32) {
    %c0_i32 = arith.constant 0 : i32
    %c0_i32_0 = arith.constant 0 : i32
    %c0_i32_1 = arith.constant 0 : i32
    return %c0_i32, %c0_i32_0 : i32, i32
  }
  func.func @transform_5(%arg0: i32) -> (i32, i32) {
    %c0_i32 = arith.constant 0 : i32
    %c0_i32_0 = arith.constant 0 : i32
    return %arg0, %c0_i32 : i32, i32
  }
}

</mosaic_0001>

<bundles_post_ra>
// kernel: tpu_custom_call.1
= control target key start
LH: loop header
LB: loop body
LE: loop exit
PB: predicated region body
PF: predicated region fallthrough
CT: control target
= control target key end

     0   :  { %10 = vsyncpa [#allocation3], 0  ;;  %s1394_s0 = inlined_call_operand.hbm [shape: f32[16,2,8,64], index: 0, kind: input, shape index: {}]   ;;  %s1395_s1 = inlined_call_operand.hbm [shape: f32[64,64], index: 1, kind: input, shape index: {}]   ;;  %s1396_s2 = inlined_call_operand.hbm [shape: f32[64,64], index: 2, kind: input, shape index: {}]   ;;  %s1397_s3 = inlined_call_operand.vmem [shape: f32[1,64], index: 3, kind: input, shape index: {}]   ;;  %s1398_s4 = inlined_call_operand.vmem [shape: f32[1,64], index: 4, kind: input, shape index: {}]   ;;  %s1399_s5 = inlined_call_operand.vmem [shape: f32[128,64], index: 5, kind: output, shape index: {}]  }
   0x1   :  { %11 = vsyncpa [#allocation5], 0  ;;  %s1036_s18 = smov [#allocation4]   ;;  %s1037_s20 = smov [#allocation2]  }
   0x2   :  { %s29_s19 = sshll.u32 %s1036_s18, 4  ;;  %s17_s21 = sshll.u32 %s1037_s20, 4  ;;  %s30_s19 = int_to_ptr.vmem [resolvable:$true] %s29_s19  ;;  %s18_s21 = int_to_ptr.vmem [resolvable:$true] %s17_s21 }
   0x3   :  { %s980_s22 = scalar_lea.vmem %s30_s19, 1024  ;;  %p985_p1 = scmp.lt.s32.totalorder %s30_s19, %s30_s19 }
   0x4   :  { %p981_p0 = scmp.ne.s32.totalorder %s30_s19, %s980_s22  ;;  %p986_p2 = scmp.lt.s32.totalorder %s980_s22, %s980_s22 }
   0x6   :  { %p987_p3 = por %p986_p2, %p985_p1 }
   0x8   :  { %p988_p4 = pnand %p987_p3, %p981_p0 }
   0xa   :  { %991 = shalt.err (!%p988_p4)
}
   0xb   :  { %s1038_s23 = smov 128   ;;  %s1039_s24 = smov 8  }
   0xc   :  { %35 = dma.hbm_to_vmem [thread:$0]  %s1395_s1, 1024, %s30_s19, [#allocation5], %s1038_s23, %s1038_s23, %s1039_s24  }
   0xd   :  { %s1000_s27 = scalar_lea.vmem %s18_s21, 4096  ;;  %p1005_p6 = scmp.lt.s32.totalorder %s18_s21, %s18_s21 }
   0xe   :  { %p1001_p5 = scmp.ne.s32.totalorder %s18_s21, %s1000_s27  ;;  %p1006_p7 = scmp.lt.s32.totalorder %s1000_s27, %s1000_s27 }
  0x10   :  { %p1007_p8 = por %p1006_p7, %p1005_p6 }
  0x12   :  { %p1008_p9 = pnand %p1007_p8, %p1001_p5 }
  0x14   :  { %1011 = shalt.err (!%p1008_p9)
}
  0x15   :  { %23 = dma.hbm_to_vmem [thread:$0]  %s1394_s0, 4096, %s18_s21, [#allocation3], %s1038_s23, %s1038_s23, %s1039_s24  }
  0x16   :  { %s1040_s30 = smov [#allocation6]  }
  0x17   :  { %s41_s6 = sshll.u32 %s1040_s30, 4  ;;  %s42_s6 = int_to_ptr.vmem [resolvable:$true] %s41_s6 }
  0x18   :  { %s1020_s7 = scalar_lea.vmem %s42_s6, 1024  ;;  %p1025_p11 = scmp.lt.s32.totalorder %s42_s6, %s42_s6 }
  0x19   :  { %p1021_p10 = scmp.ne.s32.totalorder %s42_s6, %s1020_s7  ;;  %p1026_p12 = scmp.lt.s32.totalorder %s1020_s7, %s1020_s7 }
  0x1b   :  { %p1027_p13 = por %p1026_p12, %p1025_p11 }
  0x1d   :  { %p1028_p0 = pnand %p1027_p13, %p1021_p10 }
  0x1f   :  { %1031 = shalt.err (!%p1028_p0)
}
  0x20   :  { %47 = dma.hbm_to_vmem [thread:$0]  %s1396_s2, 1024, %s42_s6, [#allocation5], %s1038_s23, %s1038_s23, %s1039_s24  }
  0x21   :  { %1032 = dma.done.wait [#allocation3], 4096  }
  0x22   :  { %1033 = vsyncadd [#allocation3], 4294963200 }
  0x23   :  { %1034 = dma.done.wait [#allocation5], 2048  }
  0x24   :  { %1035 = vsyncadd [#allocation5], 4294965248  ;;  %v108_v0 = vld [vmem:[#allocation6 + $0x38] sm:$0xff]  ;;  %v107_v2 = vld [vmem:[#allocation6 + $0x30] sm:$0xff]  ;;  %vm109_vm0 = vcmask 523264  }
  0x25   :  { %v100_v1 = vld [vmem:[#allocation4 + $0x38] sm:$0xff]  ;;  %855 = vmatprep.subr.mxu0 %v108_v0  ;;  %v99_v3 = vld [vmem:[#allocation4 + $0x30] sm:$0xff]  ;;  %v106_v4 = vld [vmem:[#allocation6 + $0x28] sm:$0xff] }
  0x26   :  { %895 = vmatprep.subr.mxu1 %v100_v1  ;;  %856 = vmatpush3.msra.mxu0 %v108_v0  ;;  %v98_v5 = vld [vmem:[#allocation4 + $0x28] sm:$0xff]  ;;  %v105_v6 = vld [vmem:[#allocation6 + $0x20] sm:$0xff]  ;;  %v104_v8 = vld [vmem:[#allocation6 + $0x18] sm:$0xff] }
  0x27   :  { %896 = vmatpush3.msra.mxu1 %v100_v1  ;;  %857 = vmatprep.subr.mxu0 %v107_v2  ;;  %v97_v7 = vld [vmem:[#allocation4 + $0x20] sm:$0xff]  ;;  %v96_v9 = vld [vmem:[#allocation4 + $0x18] sm:$0xff]  ;;  %v103_v10 = vld [vmem:[#allocation6 + $0x10] sm:$0xff] }
  0x28   :  { %897 = vmatprep.subr.mxu1 %v99_v3  ;;  %858 = vmatpush3.msra.mxu0 %v107_v2  ;;  %v95_v11 = vld [vmem:[#allocation4 + $0x10] sm:$0xff]  ;;  %v102_v12 = vld [vmem:[#allocation6 + $0x8] sm:$0xff]  ;;  %v101_v14 = vld [vmem:[#allocation6] sm:$0xff] }
  0x29   :  { %898 = vmatpush3.msra.mxu1 %v99_v3  ;;  %859 = vmatprep.subr.mxu0 %v106_v4  ;;  %v94_v13 = vld [vmem:[#allocation4 + $0x8] sm:$0xff]  ;;  %v93_v15 = vld [vmem:[#allocation4] sm:$0xff]  ;;  %v64_v18 = vld [vmem:[#allocation2 + $0x18] sm:$0xff] }
  0x2a   :  { %899 = vmatprep.subr.mxu1 %v98_v5  ;;  %860 = vmatpush3.msra.mxu0 %v106_v4  ;;  %v62_v16 = vld [vmem:[#allocation2 + $0x8] sm:$0xff]  ;;  %v61_v17 = vld [vmem:[#allocation2] sm:$0xff]  ;;  %v63_v19 = vld [vmem:[#allocation2 + $0x10] sm:$0xff] }
  0x2b   :  { %900 = vmatpush3.msra.mxu1 %v98_v5  ;;  %861 = vmatprep.subr.mxu0 %v105_v6  ;;  %v66_v20 = vld [vmem:[#allocation2 + $0x28] sm:$0xff]  ;;  %v65_v21 = vld [vmem:[#allocation2 + $0x20] sm:$0xff]  ;;  %v68_v22 = vld [vmem:[#allocation2 + $0x38] sm:$0xff] }
  0x2c   :  { %901 = vmatprep.subr.mxu1 %v97_v7  ;;  %862 = vmatpush3.msra.mxu0 %v105_v6  ;;  %v67_v23 = vld [vmem:[#allocation2 + $0x30] sm:$0xff]  ;;  %v70_v24 = vld [vmem:[#allocation2 + $0x48] sm:$0xff]  ;;  %v69_v25 = vld [vmem:[#allocation2 + $0x40] sm:$0xff] }
  0x2d   :  { %902 = vmatpush3.msra.mxu1 %v97_v7  ;;  %863 = vmatprep.subr.mxu0 %v104_v8  ;;  %v72_v26 = vld [vmem:[#allocation2 + $0x58] sm:$0xff]  ;;  %v71_v27 = vld [vmem:[#allocation2 + $0x50] sm:$0xff]  ;;  %v74_v28 = vld [vmem:[#allocation2 + $0x68] sm:$0xff] }
  0x2e   :  { %903 = vmatprep.subr.mxu1 %v96_v9  ;;  %864 = vmatpush3.msra.mxu0 %v104_v8  ;;  %v73_v29 = vld [vmem:[#allocation2 + $0x60] sm:$0xff]  ;;  %v76_v30 = vld [vmem:[#allocation2 + $0x78] sm:$0xff]  ;;  %v75_v31 = vld [vmem:[#allocation2 + $0x70] sm:$0xff] }
  0x2f   :  { %904 = vmatpush3.msra.mxu1 %v96_v9  ;;  %865 = vmatprep.subr.mxu0 %v103_v10  ;;  %v78_v32 = vld [vmem:[#allocation2 + $0x88] sm:$0xff]  ;;  %v77_v33 = vld [vmem:[#allocation2 + $0x80] sm:$0xff]  ;;  %v80_v34 = vld [vmem:[#allocation2 + $0x98] sm:$0xff] }
  0x30   :  { %905 = vmatprep.subr.mxu1 %v95_v11  ;;  %866 = vmatpush3.msra.mxu0 %v103_v10  ;;  %v79_v35 = vld [vmem:[#allocation2 + $0x90] sm:$0xff]  ;;  %v82_v36 = vld [vmem:[#allocation2 + $0xa8] sm:$0xff]  ;;  %v81_v37 = vld [vmem:[#allocation2 + $0xa0] sm:$0xff] }
  0x31   :  { %906 = vmatpush3.msra.mxu1 %v95_v11  ;;  %867 = vmatprep.subr.mxu0 %v102_v12  ;;  %v84_v38 = vld [vmem:[#allocation2 + $0xb8] sm:$0xff]  ;;  %v83_v39 = vld [vmem:[#allocation2 + $0xb0] sm:$0xff]  ;;  %v86_v40 = vld [vmem:[#allocation2 + $0xc8] sm:$0xff] }
  0x32   :  { %907 = vmatprep.subr.mxu1 %v94_v13  ;;  %868 = vmatpush3.msra.mxu0 %v102_v12  ;;  %v85_v41 = vld [vmem:[#allocation2 + $0xc0] sm:$0xff]  ;;  %v88_v42 = vld [vmem:[#allocation2 + $0xd8] sm:$0xff]  ;;  %v87_v43 = vld [vmem:[#allocation2 + $0xd0] sm:$0xff] }
  0x33   :  { %908 = vmatpush3.msra.mxu1 %v94_v13  ;;  %869 = vmatprep.subr.mxu0 %v101_v14  ;;  %v90_v44 = vld [vmem:[#allocation2 + $0xe8] sm:$0xff]  ;;  %v89_v45 = vld [vmem:[#allocation2 + $0xe0] sm:$0xff]  ;;  %v92_v46 = vld [vmem:[#allocation2 + $0xf8] sm:$0xff] }
  0x34   :  { %909 = vmatprep.subr.mxu1 %v93_v15  ;;  %870 = vmatpush3.msra.mxu0 %v101_v14  ;;  %v91_v47 = vld [vmem:[#allocation2 + $0xf0] sm:$0xff] }
  0x35   :  { %871 = vmatprep.mubr.msk.f32.mxu0 %vm109_vm0, %v62_v16  ;;  %910 = vmatpush3.msra.mxu1 %v93_v15 }
  0x36   :  { %911 = vmatprep.mubr.msk.f32.mxu1 %vm109_vm0, %v61_v17  ;;  %872 = vmatmul.mubr.msk.f32.vlgmr.msra.gmra.mxu0 %vm109_vm0, %v64_v18 }
  0x37   :  { %912 = vmatmul.mubr.msk.f32.vlgmr.msra.gmra.mxu1 %vm109_vm0, %v63_v19  ;;  %874 = vmatprep.mubr.msk.f32.mxu0 %vm109_vm0, %v66_v20 }
  0x38   :  { %914 = vmatprep.mubr.msk.f32.mxu1 %vm109_vm0, %v65_v21 }
  0x3a   :  { %875 = vmatmul.mubr.msk.f32.gmra.mxu0 %vm109_vm0, %v68_v22 }
  0x3b   :  { %915 = vmatmul.mubr.msk.f32.gmra.mxu1 %vm109_vm0, %v67_v23  ;;  %877 = vmatprep.mubr.msk.f32.mxu0 %vm109_vm0, %v70_v24 }
  0x3c   :  { %917 = vmatprep.mubr.msk.f32.mxu1 %vm109_vm0, %v69_v25 }
  0x3e   :  { %878 = vmatmul.mubr.msk.f32.gmra.mxu0 %vm109_vm0, %v72_v26 }
  0x3f   :  { %918 = vmatmul.mubr.msk.f32.gmra.mxu1 %vm109_vm0, %v71_v27  ;;  %880 = vmatprep.mubr.msk.f32.mxu0 %vm109_vm0, %v74_v28 }
  0x40   :  { %920 = vmatprep.mubr.msk.f32.mxu1 %vm109_vm0, %v73_v29 }
  0x42   :  { %881 = vmatmul.mubr.msk.f32.gmra.mxu0 %vm109_vm0, %v76_v30 }
  0x43   :  { %921 = vmatmul.mubr.msk.f32.gmra.mxu1 %vm109_vm0, %v75_v31  ;;  %883 = vmatprep.mubr.msk.f32.mxu0 %vm109_vm0, %v78_v32 }
  0x44   :  { %923 = vmatprep.mubr.msk.f32.mxu1 %vm109_vm0, %v77_v33 }
  0x46   :  { %884 = vmatmul.mubr.msk.f32.gmra.mxu0 %vm109_vm0, %v80_v34 }
  0x47   :  { %924 = vmatmul.mubr.msk.f32.gmra.mxu1 %vm109_vm0, %v79_v35  ;;  %886 = vmatprep.mubr.msk.f32.mxu0 %vm109_vm0, %v82_v36 }
  0x48   :  { %926 = vmatprep.mubr.msk.f32.mxu1 %vm109_vm0, %v81_v37 }
  0x4a   :  { %887 = vmatmul.mubr.msk.f32.gmra.mxu0 %vm109_vm0, %v84_v38 }
  0x4b   :  { %927 = vmatmul.mubr.msk.f32.gmra.mxu1 %vm109_vm0, %v83_v39  ;;  %889 = vmatprep.mubr.msk.f32.mxu0 %vm109_vm0, %v86_v40 }
  0x4c   :  { %929 = vmatprep.mubr.msk.f32.mxu1 %vm109_vm0, %v85_v41 }
  0x4e   :  { %890 = vmatmul.mubr.msk.f32.gmra.mxu0 %vm109_vm0, %v88_v42 }
  0x4f   :  { %930 = vmatmul.mubr.msk.f32.gmra.mxu1 %vm109_vm0, %v87_v43  ;;  %892 = vmatprep.mubr.msk.f32.mxu0 %vm109_vm0, %v90_v44 }
  0x50   :  { %932 = vmatprep.mubr.msk.f32.mxu1 %vm109_vm0, %v89_v45 }
  0x52   :  { %893 = vmatmul.mubr.msk.f32.gmra.mxu0 %vm109_vm0, %v92_v46 }
  0x53   :  { %933 = vmatmul.mubr.msk.f32.gmra.mxu1 %vm109_vm0, %v91_v47 }
  0xf6   :  { %v873_v48 = vpop.f32.mrf.mxu0 }
  0xf7   :  { %v913_v49 = vpop.f32.mrf.mxu1 }
  0xf8   :  { %v1112_v50 = vadd.f32 %v913_v49, %v873_v48  ;;  %v224_v51 = vpop.f32.mrf.mxu0 }
  0xf9   :  { %v417_v52 = vpop.f32.mrf.mxu1 }
  0xfa   :  { %v1114_v53 = vadd.f32 %v417_v52, %v224_v51  ;;  %v499_v54 = vsel %vm109_vm0, %v1112_v50, 0.0  ;;  %v876_v55 = vpop.f32.mrf.mxu0 }
  0xfb   :  { %500 = vadd.xlane.f32.xlu0 %v499_v54  ;;  %v916_v56 = vpop.f32.mrf.mxu1 }
  0xfc   :  { %v1118_v57 = vadd.f32 %v916_v56, %v876_v55  ;;  %v234_v58 = vpop.f32.mrf.mxu0  ;;  %v496_v62 = vsel %vm109_vm0, %v1114_v53, 0.0 }
  0xfd   :  { %v427_v59 = vpop.f32.mrf.mxu1 }
  0xfe   :  { %v1120_v60 = vadd.f32 %v427_v59, %v234_v58  ;;  %v505_v61 = vsel %vm109_vm0, %v1118_v57, 0.0  ;;  %v879_v63 = vpop.f32.mrf.mxu0 }
  0xff   :  { %506 = vadd.xlane.f32.xlu1 %v505_v61  ;;  %v919_v0 = vpop.f32.mrf.mxu1  ;;  %497 = vadd.xlane.f32.xlu0 %v496_v62 }
 0x100   :  { %v244_v1 = vpop.f32.mrf.mxu0  ;;  %v1126_v3 = vadd.f32 %v919_v0, %v879_v63  ;;  %v502_v5 = vsel %vm109_vm0, %v1120_v60, 0.0 }
 0x101   :  { %v437_v2 = vpop.f32.mrf.mxu1 }
 0x102   :  { %v1128_v4 = vadd.f32 %v437_v2, %v244_v1  ;;  %v882_v6 = vpop.f32.mrf.mxu0  ;;  %v511_v13 = vsel %vm109_vm0, %v1126_v3, 0.0 }
 0x103   :  { %v922_v7 = vpop.f32.mrf.mxu1  ;;  %503 = vadd.xlane.f32.xlu1 %v502_v5 }
 0x104   :  { %v508_v8 = vsel %vm109_vm0, %v1128_v4, 0.0  ;;  %v254_v9 = vpop.f32.mrf.mxu0  ;;  %v1134_v11 = vadd.f32 %v922_v7, %v882_v6 }
 0x105   :  { %v447_v10 = vpop.f32.mrf.mxu1  ;;  %509 = vadd.xlane.f32.xlu0 %v508_v8 }
 0x106   :  { %v1136_v12 = vadd.f32 %v447_v10, %v254_v9  ;;  %v885_v14 = vpop.f32.mrf.mxu0  ;;  %v517_v21 = vsel %vm109_vm0, %v1134_v11, 0.0 }
 0x107   :  { %v925_v15 = vpop.f32.mrf.mxu1  ;;  %512 = vadd.xlane.f32.xlu1 %v511_v13 }
 0x108   :  { %v514_v16 = vsel %vm109_vm0, %v1136_v12, 0.0  ;;  %v264_v17 = vpop.f32.mrf.mxu0  ;;  %v1142_v19 = vadd.f32 %v925_v15, %v885_v14 }
 0x109   :  { %v457_v18 = vpop.f32.mrf.mxu1  ;;  %515 = vadd.xlane.f32.xlu0 %v514_v16 }
 0x10a   :  { %v1144_v20 = vadd.f32 %v457_v18, %v264_v17  ;;  %v888_v22 = vpop.f32.mrf.mxu0  ;;  %v523_v29 = vsel %vm109_vm0, %v1142_v19, 0.0 }
 0x10b   :  { %v928_v23 = vpop.f32.mrf.mxu1  ;;  %518 = vadd.xlane.f32.xlu1 %v517_v21 }
 0x10c   :  { %v520_v24 = vsel %vm109_vm0, %v1144_v20, 0.0  ;;  %v274_v25 = vpop.f32.mrf.mxu0  ;;  %v1150_v27 = vadd.f32 %v928_v23, %v888_v22 }
 0x10d   :  { %v467_v26 = vpop.f32.mrf.mxu1  ;;  %521 = vadd.xlane.f32.xlu0 %v520_v24 }
 0x10e   :  { %v1152_v28 = vadd.f32 %v467_v26, %v274_v25  ;;  %v891_v30 = vpop.f32.mrf.mxu0  ;;  %v529_v37 = vsel %vm109_vm0, %v1150_v27, 0.0 }
 0x10f   :  { %v931_v31 = vpop.f32.mrf.mxu1  ;;  %524 = vadd.xlane.f32.xlu1 %v523_v29 }
 0x110   :  { %v526_v32 = vsel %vm109_vm0, %v1152_v28, 0.0  ;;  %v284_v33 = vpop.f32.mrf.mxu0  ;;  %v1158_v35 = vadd.f32 %v931_v31, %v891_v30 }
 0x111   :  { %v477_v34 = vpop.f32.mrf.mxu1  ;;  %527 = vadd.xlane.f32.xlu0 %v526_v32 }
 0x112   :  { %v1160_v36 = vadd.f32 %v477_v34, %v284_v33  ;;  %v894_v38 = vpop.f32.mrf.mxu0  ;;  %v535_v45 = vsel %vm109_vm0, %v1158_v35, 0.0 }
 0x113   :  { %v934_v39 = vpop.f32.mrf.mxu1  ;;  %530 = vadd.xlane.f32.xlu1 %v529_v37 }
 0x114   :  { %v532_v40 = vsel %vm109_vm0, %v1160_v36, 0.0  ;;  %v294_v41 = vpop.f32.mrf.mxu0  ;;  %v1166_v43 = vadd.f32 %v934_v39, %v894_v38 }
 0x115   :  { %v487_v42 = vpop.f32.mrf.mxu1  ;;  %533 = vadd.xlane.f32.xlu0 %v532_v40 }
 0x116   :  { %v1168_v44 = vadd.f32 %v487_v42, %v294_v41  ;;  %v541_v47 = vsel %vm109_vm0, %v1166_v43, 0.0 }
 0x117   :  { %536 = vadd.xlane.f32.xlu1 %v535_v45 }
 0x118   :  { %v538_v46 = vsel %vm109_vm0, %v1168_v44, 0.0 }
 0x119   :  { %539 = vadd.xlane.f32.xlu0 %v538_v46 }
 0x11b   :  { %542 = vadd.xlane.f32.xlu1 %v541_v47 }
 0x184   :  { %v501_v48 = vpop.xlane.xlu0 %500 }
 0x185   :  { %v546_v49 = vmul.f32 0.015625, %v501_v48 }
 0x187   :  { %v1177_v51 = vsub.f32 %v1112_v50, %v546_v49 }
 0x188   :  { %v507_v52 = vpop.xlane.xlu1 %506  ;;  %v498_v54 = vpop.xlane.xlu0 %497 }
 0x189   :  { %v548_v55 = vmul.f32 0.015625, %v507_v52  ;;  %v545_v56 = vmul.f32 0.015625, %v498_v54  ;;  %v578_v58 = vmul.f32 %v1177_v51, %v1177_v51 }
 0x18b   :  { %v1182_v59 = vsub.f32 %v1118_v57, %v548_v55  ;;  %v1185_v61 = vsub.f32 %v1114_v53, %v545_v56  ;;  %v596_v62 = vsel %vm109_vm0, %v578_v58, 0.0 }
 0x18c   :  { %597 = vadd.xlane.f32.xlu1 %v596_v62  ;;  %v504_v63 = vpop.xlane.xlu1 %503 }
 0x18d   :  { %v547_v0 = vmul.f32 0.015625, %v504_v63  ;;  %v580_v50 = vmul.f32 %v1182_v59, %v1182_v59  ;;  %v577_v1 = vmul.f32 %v1185_v61, %v1185_v61 }
 0x18e   :  { %v510_v2 = vpop.xlane.xlu0 %509 }
 0x18f   :  { %v1193_v5 = vsub.f32 %v1120_v60, %v547_v0  ;;  %v549_v57 = vmul.f32 0.015625, %v510_v2  ;;  %v602_v6 = vsel %vm109_vm0, %v580_v50, 0.0  ;;  %v593_v53 = vsel %vm109_vm0, %v577_v1, 0.0 }
 0x190   :  { %603 = vadd.xlane.f32.xlu1 %v602_v6  ;;  %v513_v7 = vpop.xlane.xlu1 %512  ;;  %594 = vadd.xlane.f32.xlu0 %v593_v53 }
 0x191   :  { %v1198_v8 = vsub.f32 %v1128_v4, %v549_v57  ;;  %v550_v9 = vmul.f32 0.015625, %v513_v7  ;;  %v579_v10 = vmul.f32 %v1193_v5, %v1193_v5 }
 0x192   :  { %v516_v13 = vpop.xlane.xlu0 %515 }
 0x193   :  { %v1203_v14 = vsub.f32 %v1126_v3, %v550_v9  ;;  %v551_v60 = vmul.f32 0.015625, %v516_v13  ;;  %v599_v15 = vsel %vm109_vm0, %v579_v10, 0.0  ;;  %v581_v16 = vmul.f32 %v1198_v8, %v1198_v8 }
 0x194   :  { %v519_v17 = vpop.xlane.xlu1 %518  ;;  %600 = vadd.xlane.f32.xlu0 %v599_v15 }
 0x195   :  { %v1209_v18 = vsub.f32 %v1136_v12, %v551_v60  ;;  %v552_v4 = vmul.f32 0.015625, %v519_v17  ;;  %v582_v21 = vmul.f32 %v1203_v14, %v1203_v14  ;;  %v605_v23 = vsel %vm109_vm0, %v581_v16, 0.0 }
 0x196   :  { %v522_v22 = vpop.xlane.xlu0 %521 }
 0x197   :  { %v1215_v3 = vsub.f32 %v1134_v11, %v552_v4  ;;  %v553_v24 = vmul.f32 0.015625, %v522_v22  ;;  %v608_v25 = vsel %vm109_vm0, %v582_v21, 0.0  ;;  %v583_v26 = vmul.f32 %v1209_v18, %v1209_v18 }
 0x198   :  { %609 = vadd.xlane.f32.xlu1 %v608_v25  ;;  %v525_v29 = vpop.xlane.xlu1 %524  ;;  %606 = vadd.xlane.f32.xlu0 %v605_v23 }
 0x199   :  { %v1221_v12 = vsub.f32 %v1144_v20, %v553_v24  ;;  %v554_v30 = vmul.f32 0.015625, %v525_v29  ;;  %v584_v31 = vmul.f32 %v1215_v3, %v1215_v3  ;;  %v611_v11 = vsel %vm109_vm0, %v583_v26, 0.0 }
 0x19a   :  { %v528_v32 = vpop.xlane.xlu0 %527 }
 0x19b   :  { %v1227_v33 = vsub.f32 %v1142_v19, %v554_v30  ;;  %v555_v34 = vmul.f32 0.015625, %v528_v32  ;;  %v614_v37 = vsel %vm109_vm0, %v584_v31, 0.0  ;;  %v585_v38 = vmul.f32 %v1221_v12, %v1221_v12 }
 0x19c   :  { %615 = vadd.xlane.f32.xlu1 %v614_v37  ;;  %v531_v39 = vpop.xlane.xlu1 %530  ;;  %612 = vadd.xlane.f32.xlu0 %v611_v11 }
 0x19d   :  { %v1233_v20 = vsub.f32 %v1152_v28, %v555_v34  ;;  %v556_v40 = vmul.f32 0.015625, %v531_v39  ;;  %v586_v41 = vmul.f32 %v1227_v33, %v1227_v33  ;;  %v617_v19 = vsel %vm109_vm0, %v585_v38, 0.0  ;;  %v1275_v39 = vld [vmem:[%s1397_s3] ss:$0 sm:$0xff] }
 0x19e   :  { %v534_v42 = vpop.xlane.xlu0 %533 }
 0x19f   :  { %v1239_v45 = vsub.f32 %v1150_v27, %v556_v40  ;;  %v557_v46 = vmul.f32 0.015625, %v534_v42  ;;  %v620_v47 = vsel %vm109_vm0, %v586_v41, 0.0  ;;  %v587_v48 = vmul.f32 %v1233_v20, %v1233_v20 }
 0x1a0   :  { %621 = vadd.xlane.f32.xlu1 %v620_v47  ;;  %v537_v49 = vpop.xlane.xlu1 %536  ;;  %618 = vadd.xlane.f32.xlu0 %v617_v19  ;;  %v1281_v19 = vld [vmem:[%s1398_s4] ss:$0 sm:$0xff] }
 0x1a1   :  { %v1245_v28 = vsub.f32 %v1160_v36, %v557_v46  ;;  %v558_v52 = vmul.f32 0.015625, %v537_v49  ;;  %v588_v54 = vmul.f32 %v1239_v45, %v1239_v45  ;;  %v623_v27 = vsel %vm109_vm0, %v587_v48, 0.0 }
 0x1a2   :  { %v540_v55 = vpop.xlane.xlu0 %539 }
 0x1a3   :  { %v1251_v56 = vsub.f32 %v1158_v35, %v558_v52  ;;  %v559_v58 = vmul.f32 0.015625, %v540_v55  ;;  %v626_v62 = vsel %vm109_vm0, %v588_v54, 0.0  ;;  %v589_v63 = vmul.f32 %v1245_v28, %v1245_v28 }
 0x1a4   :  { %627 = vadd.xlane.f32.xlu1 %v626_v62  ;;  %v543_v0 = vpop.xlane.xlu1 %542  ;;  %624 = vadd.xlane.f32.xlu0 %v623_v27 }
 0x1a5   :  { %v1257_v36 = vsub.f32 %v1168_v44, %v559_v58  ;;  %v560_v50 = vmul.f32 0.015625, %v543_v0  ;;  %v590_v1 = vmul.f32 %v1251_v56, %v1251_v56  ;;  %v629_v57 = vsel %vm109_vm0, %v589_v63, 0.0 }
 0x1a7   :  { %v1262_v2 = vsub.f32 %v1166_v43, %v560_v50  ;;  %v632_v35 = vsel %vm109_vm0, %v590_v1, 0.0  ;;  %v591_v6 = vmul.f32 %v1257_v36, %v1257_v36 }
 0x1a8   :  { %633 = vadd.xlane.f32.xlu1 %v632_v35  ;;  %630 = vadd.xlane.f32.xlu0 %v629_v57 }
 0x1a9   :  { %v592_v44 = vmul.f32 %v1262_v2, %v1262_v2  ;;  %v635_v7 = vsel %vm109_vm0, %v591_v6, 0.0 }
 0x1ab   :  { %v638_v53 = vsel %vm109_vm0, %v592_v44, 0.0 }
 0x1ac   :  { %639 = vadd.xlane.f32.xlu1 %v638_v53  ;;  %636 = vadd.xlane.f32.xlu0 %v635_v7 }
 0x215   :  { %v598_v43 = vpop.xlane.xlu1 %597 }
 0x216   :  { %v642_v9 = vmul.f32 0.015625, %v598_v43 }
 0x218   :  { %v658_v10 = vadd.f32 1e-05, %v642_v9 }
 0x219   :  { %v604_v13 = vpop.xlane.xlu1 %603  ;;  %v595_v60 = vpop.xlane.xlu0 %594 }
 0x21a   :  { %940 = vrsqrt.f32 %v658_v10  ;;  %v644_v15 = vmul.f32 0.015625, %v604_v13  ;;  %v641_v16 = vmul.f32 0.015625, %v595_v60 }
 0x21c   :  { %v660_v17 = vadd.f32 1e-05, %v644_v15  ;;  %v657_v4 = vadd.f32 1e-05, %v641_v16 }
 0x21d   :  { %v601_v21 = vpop.xlane.xlu0 %600 }
 0x21e   :  { %942 = vrsqrt.f32 %v660_v17  ;;  %v643_v22 = vmul.f32 0.015625, %v601_v21 }
 0x21f   :  { %944 = vrsqrt.f32 %v657_v4 }
 0x220   :  { %v659_v23 = vadd.f32 1e-05, %v643_v22 }
 0x221   :  { %v610_v24 = vpop.xlane.xlu1 %609  ;;  %v607_v25 = vpop.xlane.xlu0 %606 }
 0x222   :  { %946 = vrsqrt.f32 %v659_v23  ;;  %v646_v26 = vmul.f32 0.015625, %v610_v24  ;;  %v645_v29 = vmul.f32 0.015625, %v607_v25 }
 0x224   :  { %v662_v30 = vadd.f32 1e-05, %v646_v26  ;;  %v661_v31 = vadd.f32 1e-05, %v645_v29 }
 0x225   :  { %v616_v32 = vpop.xlane.xlu1 %615  ;;  %v613_v11 = vpop.xlane.xlu0 %612 }
 0x226   :  { %948 = vrsqrt.f32 %v662_v30  ;;  %v648_v34 = vmul.f32 0.015625, %v616_v32  ;;  %v647_v37 = vmul.f32 0.015625, %v613_v11 }
 0x227   :  { %v941_v38 = vpop.eup %940  ;;  %950 = vrsqrt.f32 %v661_v31 }
 0x228   :  { %v690_v40 = vmul.f32 %v941_v38, %v1177_v51  ;;  %v664_v41 = vadd.f32 1e-05, %v648_v34  ;;  %v663_v42 = vadd.f32 1e-05, %v647_v37 }
 0x229   :  { %v622_v46 = vpop.xlane.xlu1 %621  ;;  %v619_v47 = vpop.xlane.xlu0 %618 }
 0x22a   :  { %v713_v48 = vmul.f32 %v1275_v39, %v690_v40  ;;  %952 = vrsqrt.f32 %v664_v41  ;;  %v650_v49 = vmul.f32 0.015625, %v622_v46  ;;  %v649_v52 = vmul.f32 0.015625, %v619_v47 }
 0x22b   :  { %v943_v54 = vpop.eup %942  ;;  %954 = vrsqrt.f32 %v663_v42 }
 0x22c   :  { %v945_v55 = vpop.eup %944  ;;  %v736_v27 = vadd.f32 %v1281_v19, %v713_v48  ;;  %v692_v51 = vmul.f32 %v943_v54, %v1182_v59  ;;  %v666_v58 = vadd.f32 1e-05, %v650_v49  ;;  %v665_v62 = vadd.f32 1e-05, %v649_v52 }
 0x22d   :  { %v689_v63 = vmul.f32 %v945_v55, %v1185_v61  ;;  %v628_v0 = vpop.xlane.xlu1 %627  ;;  %v625_v50 = vpop.xlane.xlu0 %624 }
 0x22e   :  { %752 = vst.msk [vmem:[%s1399_s5 + $0x8] sm:$0xff] %vm109_vm0, %v736_v27  ;;  %v715_v1 = vmul.f32 %v1275_v39, %v692_v51  ;;  %956 = vrsqrt.f32 %v666_v58  ;;  %v652_v35 = vmul.f32 0.015625, %v628_v0  ;;  %v651_v57 = vmul.f32 0.015625, %v625_v50 }
 0x22f   :  { %v947_v6 = vpop.eup %946  ;;  %v712_v44 = vmul.f32 %v1275_v39, %v689_v63  ;;  %958 = vrsqrt.f32 %v665_v62 }
 0x230   :  { %v738_v59 = vadd.f32 %v1281_v19, %v715_v1  ;;  %v691_v61 = vmul.f32 %v947_v6, %v1193_v5  ;;  %v668_v53 = vadd.f32 1e-05, %v652_v35  ;;  %v667_v7 = vadd.f32 1e-05, %v651_v57 }
 0x231   :  { %v735_v43 = vadd.f32 %v1281_v19, %v712_v44  ;;  %v634_v9 = vpop.xlane.xlu1 %633  ;;  %v631_v10 = vpop.xlane.xlu0 %630 }
 0x232   :  { %754 = vst.msk [vmem:[%s1399_s5 + $0x18] sm:$0xff] %vm109_vm0, %v738_v59  ;;  %v714_v13 = vmul.f32 %v1275_v39, %v691_v61  ;;  %960 = vrsqrt.f32 %v668_v53  ;;  %v654_v60 = vmul.f32 0.015625, %v634_v9  ;;  %v653_v15 = vmul.f32 0.015625, %v631_v10 }
 0x233   :  { %v949_v16 = vpop.eup %948  ;;  %751 = vst.msk [vmem:[%s1399_s5] sm:$0xff] %vm109_vm0, %v735_v43  ;;  %962 = vrsqrt.f32 %v667_v7 }
 0x234   :  { %v951_v5 = vpop.eup %950  ;;  %v737_v17 = vadd.f32 %v1281_v19, %v714_v13  ;;  %v694_v4 = vmul.f32 %v949_v16, %v1203_v14  ;;  %v670_v21 = vadd.f32 1e-05, %v654_v60  ;;  %v669_v22 = vadd.f32 1e-05, %v653_v15 }
 0x235   :  { %v693_v23 = vmul.f32 %v951_v5, %v1198_v8  ;;  %v640_v24 = vpop.xlane.xlu1 %639  ;;  %v637_v25 = vpop.xlane.xlu0 %636 }
 0x236   :  { %753 = vst.msk [vmem:[%s1399_s5 + $0x10] sm:$0xff] %vm109_vm0, %v737_v17  ;;  %v717_v26 = vmul.f32 %v1275_v39, %v694_v4  ;;  %964 = vrsqrt.f32 %v670_v21  ;;  %v656_v29 = vmul.f32 0.015625, %v640_v24  ;;  %v655_v30 = vmul.f32 0.015625, %v637_v25 }
 0x237   :  { %v953_v31 = vpop.eup %952  ;;  %v716_v32 = vmul.f32 %v1275_v39, %v693_v23  ;;  %966 = vrsqrt.f32 %v669_v22 }
 0x238   :  { %v955_v14 = vpop.eup %954  ;;  %v740_v11 = vadd.f32 %v1281_v19, %v717_v26  ;;  %v696_v8 = vmul.f32 %v953_v31, %v1215_v3  ;;  %v672_v34 = vadd.f32 1e-05, %v656_v29  ;;  %v671_v37 = vadd.f32 1e-05, %v655_v30 }
 0x239   :  { %v739_v38 = vadd.f32 %v1281_v19, %v716_v32  ;;  %v695_v40 = vmul.f32 %v955_v14, %v1209_v18 }
 0x23a   :  { %756 = vst.msk [vmem:[%s1399_s5 + $0x28] sm:$0xff] %vm109_vm0, %v740_v11  ;;  %v719_v41 = vmul.f32 %v1275_v39, %v696_v8  ;;  %968 = vrsqrt.f32 %v672_v34 }
 0x23b   :  { %v957_v42 = vpop.eup %956  ;;  %755 = vst.msk [vmem:[%s1399_s5 + $0x20] sm:$0xff] %vm109_vm0, %v739_v38  ;;  %v718_v3 = vmul.f32 %v1275_v39, %v695_v40  ;;  %970 = vrsqrt.f32 %v671_v37 }
 0x23c   :  { %v959_v46 = vpop.eup %958  ;;  %v742_v18 = vadd.f32 %v1281_v19, %v719_v41  ;;  %v698_v47 = vmul.f32 %v957_v42, %v1227_v33 }
 0x23d   :  { %v741_v48 = vadd.f32 %v1281_v19, %v718_v3  ;;  %v697_v49 = vmul.f32 %v959_v46, %v1221_v12 }
 0x23e   :  { %758 = vst.msk [vmem:[%s1399_s5 + $0x38] sm:$0xff] %vm109_vm0, %v742_v18  ;;  %v721_v52 = vmul.f32 %v1275_v39, %v698_v47 }
 0x23f   :  { %v961_v54 = vpop.eup %960  ;;  %757 = vst.msk [vmem:[%s1399_s5 + $0x30] sm:$0xff] %vm109_vm0, %v741_v48  ;;  %v720_v55 = vmul.f32 %v1275_v39, %v697_v49 }
 0x240   :  { %v963_v33 = vpop.eup %962  ;;  %v744_v27 = vadd.f32 %v1281_v19, %v721_v52  ;;  %v700_v12 = vmul.f32 %v961_v54, %v1239_v45 }
 0x241   :  { %v743_v51 = vadd.f32 %v1281_v19, %v720_v55  ;;  %v699_v58 = vmul.f32 %v963_v33, %v1233_v20 }
 0x242   :  { %760 = vst.msk [vmem:[%s1399_s5 + $0x48] sm:$0xff] %vm109_vm0, %v744_v27  ;;  %v723_v62 = vmul.f32 %v1275_v39, %v700_v12 }
 0x243   :  { %v965_v63 = vpop.eup %964  ;;  %759 = vst.msk [vmem:[%s1399_s5 + $0x40] sm:$0xff] %vm109_vm0, %v743_v51  ;;  %v722_v0 = vmul.f32 %v1275_v39, %v699_v58 }
 0x244   :  { %v967_v45 = vpop.eup %966  ;;  %v746_v50 = vadd.f32 %v1281_v19, %v723_v62  ;;  %v702_v20 = vmul.f32 %v965_v63, %v1251_v56 }
 0x245   :  { %v745_v1 = vadd.f32 %v1281_v19, %v722_v0  ;;  %v701_v35 = vmul.f32 %v967_v45, %v1245_v28 }
 0x246   :  { %762 = vst.msk [vmem:[%s1399_s5 + $0x58] sm:$0xff] %vm109_vm0, %v746_v50  ;;  %v725_v57 = vmul.f32 %v1275_v39, %v702_v20 }
 0x247   :  { %v969_v6 = vpop.eup %968  ;;  %761 = vst.msk [vmem:[%s1399_s5 + $0x50] sm:$0xff] %vm109_vm0, %v745_v1  ;;  %v724_v44 = vmul.f32 %v1275_v39, %v701_v35 }
 0x248   :  { %v971_v56 = vpop.eup %970  ;;  %v748_v59 = vadd.f32 %v1281_v19, %v725_v57  ;;  %v704_v28 = vmul.f32 %v969_v6, %v1262_v2 }
 0x249   :  { %v747_v61 = vadd.f32 %v1281_v19, %v724_v44  ;;  %v703_v53 = vmul.f32 %v971_v56, %v1257_v36 }
 0x24a   :  { %764 = vst.msk [vmem:[%s1399_s5 + $0x68] sm:$0xff] %vm109_vm0, %v748_v59  ;;  %v727_v7 = vmul.f32 %v1275_v39, %v704_v28 }
 0x24b   :  { %763 = vst.msk [vmem:[%s1399_s5 + $0x60] sm:$0xff] %vm109_vm0, %v747_v61  ;;  %v726_v43 = vmul.f32 %v1275_v39, %v703_v53 }
 0x24c   :  { %v750_v2 = vadd.f32 %v1281_v19, %v727_v7 }
 0x24d   :  { %v749_v9 = vadd.f32 %v1281_v19, %v726_v43 }
 0x24e   :  { %766 = vst.msk [vmem:[%s1399_s5 + $0x78] sm:$0xff] %vm109_vm0, %v750_v2 }
 0x24f   :  { %765 = vst.msk [vmem:[%s1399_s5 + $0x70] sm:$0xff] %vm109_vm0, %v749_v9 }
 0x250   :  { %771 = vsyncpa [#allocation3], 1 }
 0x251   :  { %772 = vsyncpa [#allocation5], 1 }

// kernel: tpu_custom_call.1
= control target key start
LH: loop header
LB: loop body
LE: loop exit
PB: predicated region body
PF: predicated region fallthrough
CT: control target
= control target key end

     0   :  { %10 = vsyncpa [#allocation3], 0  ;;  %s1394_s0 = inlined_call_operand.hbm [shape: f32[16,2,8,64], index: 0, kind: input, shape index: {}]   ;;  %s1395_s1 = inlined_call_operand.hbm [shape: f32[64,64], index: 1, kind: input, shape index: {}]   ;;  %s1396_s2 = inlined_call_operand.hbm [shape: f32[64,64], index: 2, kind: input, shape index: {}]   ;;  %s1397_s3 = inlined_call_operand.vmem [shape: f32[1,64], index: 3, kind: input, shape index: {}]   ;;  %s1398_s4 = inlined_call_operand.vmem [shape: f32[1,64], index: 4, kind: input, shape index: {}]   ;;  %s1399_s5 = inlined_call_operand.vmem [shape: f32[128,64], index: 5, kind: output, shape index: {}]  }
   0x1   :  { %11 = vsyncpa [#allocation5], 0  ;;  %s1036_s18 = smov [#allocation4]   ;;  %s1037_s20 = smov [#allocation2]  }
   0x2   :  { %s29_s19 = sshll.u32 %s1036_s18, 4  ;;  %s17_s21 = sshll.u32 %s1037_s20, 4  ;;  %s30_s19 = int_to_ptr.vmem [resolvable:$true] %s29_s19  ;;  %s18_s21 = int_to_ptr.vmem [resolvable:$true] %s17_s21 }
   0x3   :  { %s980_s22 = scalar_lea.vmem %s30_s19, 1024  ;;  %p985_p1 = scmp.lt.s32.totalorder %s30_s19, %s30_s19 }
   0x4   :  { %p981_p0 = scmp.ne.s32.totalorder %s30_s19, %s980_s22  ;;  %p986_p2 = scmp.lt.s32.totalorder %s980_s22, %s980_s22 }
   0x6   :  { %p987_p3 = por %p986_p2, %p985_p1 }
   0x8   :  { %p988_p4 = pnand %p987_p3, %p981_p0 }
   0xa   :  { %991 = shalt.err (!%p988_p4)
}
   0xb   :  { %s1038_s23 = smov 128   ;;  %s1039_s24 = smov 8  }
   0xc   :  { %35 = dma.hbm_to_vmem [thread:$0]  %s1395_s1, 1024, %s30_s19, [#allocation5], %s1038_s23, %s1038_s23, %s1039_s24  }
   0xd   :  { %s1000_s27 = scalar_lea.vmem %s18_s21, 4096  ;;  %p1005_p6 = scmp.lt.s32.totalorder %s18_s21, %s18_s21 }
   0xe   :  { %p1001_p5 = scmp.ne.s32.totalorder %s18_s21, %s1000_s27  ;;  %p1006_p7 = scmp.lt.s32.totalorder %s1000_s27, %s1000_s27 }
  0x10   :  { %p1007_p8 = por %p1006_p7, %p1005_p6 }
  0x12   :  { %p1008_p9 = pnand %p1007_p8, %p1001_p5 }
  0x14   :  { %1011 = shalt.err (!%p1008_p9)
}
  0x15   :  { %23 = dma.hbm_to_vmem [thread:$0]  %s1394_s0, 4096, %s18_s21, [#allocation3], %s1038_s23, %s1038_s23, %s1039_s24  }
  0x16   :  { %s1040_s30 = smov [#allocation6]  }
  0x17   :  { %s41_s6 = sshll.u32 %s1040_s30, 4  ;;  %s42_s6 = int_to_ptr.vmem [resolvable:$true] %s41_s6 }
  0x18   :  { %s1020_s7 = scalar_lea.vmem %s42_s6, 1024  ;;  %p1025_p11 = scmp.lt.s32.totalorder %s42_s6, %s42_s6 }
  0x19   :  { %p1021_p10 = scmp.ne.s32.totalorder %s42_s6, %s1020_s7  ;;  %p1026_p12 = scmp.lt.s32.totalorder %s1020_s7, %s1020_s7 }
  0x1b   :  { %p1027_p13 = por %p1026_p12, %p1025_p11 }
  0x1d   :  { %p1028_p0 = pnand %p1027_p13, %p1021_p10 }
  0x1f   :  { %1031 = shalt.err (!%p1028_p0)
}
  0x20   :  { %47 = dma.hbm_to_vmem [thread:$0]  %s1396_s2, 1024, %s42_s6, [#allocation5], %s1038_s23, %s1038_s23, %s1039_s24  }
  0x21   :  { %1032 = dma.done.wait [#allocation3], 4096  }
  0x22   :  { %1033 = vsyncadd [#allocation3], 4294963200 }
  0x23   :  { %1034 = dma.done.wait [#allocation5], 2048  }
  0x24   :  { %1035 = vsyncadd [#allocation5], 4294965248  ;;  %v108_v0 = vld [vmem:[#allocation6 + $0x38] sm:$0xff]  ;;  %v107_v2 = vld [vmem:[#allocation6 + $0x30] sm:$0xff]  ;;  %vm109_vm0 = vcmask 523264  }
  0x25   :  { %v100_v1 = vld [vmem:[#allocation4 + $0x38] sm:$0xff]  ;;  %855 = vmatprep.subr.mxu0 %v108_v0  ;;  %v99_v3 = vld [vmem:[#allocation4 + $0x30] sm:$0xff]  ;;  %v106_v4 = vld [vmem:[#allocation6 + $0x28] sm:$0xff] }
  0x26   :  { %895 = vmatprep.subr.mxu1 %v100_v1  ;;  %856 = vmatpush3.msra.mxu0 %v108_v0  ;;  %v98_v5 = vld [vmem:[#allocation4 + $0x28] sm:$0xff]  ;;  %v105_v6 = vld [vmem:[#allocation6 + $0x20] sm:$0xff]  ;;  %v104_v8 = vld [vmem:[#allocation6 + $0x18] sm:$0xff] }
  0x27   :  { %896 = vmatpush3.msra.mxu1 %v100_v1  ;;  %857 = vmatprep.subr.mxu0 %v107_v2  ;;  %v97_v7 = vld [vmem:[#allocation4 + $0x20] sm:$0xff]  ;;  %v96_v9 = vld [vmem:[#allocation4 + $0x18] sm:$0xff]  ;;  %v103_v10 = vld [vmem:[#allocation6 + $0x10] sm:$0xff] }
  0x28   :  { %897 = vmatprep.subr.mxu1 %v99_v3  ;;  %858 = vmatpush3.msra.mxu0 %v107_v2  ;;  %v95_v11 = vld [vmem:[#allocation4 + $0x10] sm:$0xff]  ;;  %v102_v12 = vld [vmem:[#allocation6 + $0x8] sm:$0xff]  ;;  %v101_v14 = vld [vmem:[#allocation6] sm:$0xff] }
  0x29   :  { %898 = vmatpush3.msra.mxu1 %v99_v3  ;;  %859 = vmatprep.subr.mxu0 %v106_v4  ;;  %v94_v13 = vld [vmem:[#allocation4 + $0x8] sm:$0xff]  ;;  %v93_v15 = vld [vmem:[#allocation4] sm:$0xff]  ;;  %v64_v18 = vld [vmem:[#allocation2 + $0x18] sm:$0xff] }
  0x2a   :  { %899 = vmatprep.subr.mxu1 %v98_v5  ;;  %860 = vmatpush3.msra.mxu0 %v106_v4  ;;  %v62_v16 = vld [vmem:[#allocation2 + $0x8] sm:$0xff]  ;;  %v61_v17 = vld [vmem:[#allocation2] sm:$0xff]  ;;  %v63_v19 = vld [vmem:[#allocation2 + $0x10] sm:$0xff] }
  0x2b   :  { %900 = vmatpush3.msra.mxu1 %v98_v5  ;;  %861 = vmatprep.subr.mxu0 %v105_v6  ;;  %v66_v20 = vld [vmem:[#allocation2 + $0x28] sm:$0xff]  ;;  %v65_v21 = vld [vmem:[#allocation2 + $0x20] sm:$0xff]  ;;  %v68_v22 = vld [vmem:[#allocation2 + $0x38] sm:$0xff] }
  0x2c   :  { %901 = vmatprep.subr.mxu1 %v97_v7  ;;  %862 = vmatpush3.msra.mxu0 %v105_v6  ;;  %v67_v23 = vld [vmem:[#allocation2 + $0x30] sm:$0xff]  ;;  %v70_v24 = vld [vmem:[#allocation2 + $0x48] sm:$0xff]  ;;  %v69_v25 = vld [vmem:[#allocation2 + $0x40] sm:$0xff] }
  0x2d   :  { %902 = vmatpush3.msra.mxu1 %v97_v7  ;;  %863 = vmatprep.subr.mxu0 %v104_v8  ;;  %v72_v26 = vld [vmem:[#allocation2 + $0x58] sm:$0xff]  ;;  %v71_v27 = vld [vmem:[#allocation2 + $0x50] sm:$0xff]  ;;  %v74_v28 = vld [vmem:[#allocation2 + $0x68] sm:$0xff] }
  0x2e   :  { %903 = vmatprep.subr.mxu1 %v96_v9  ;;  %864 = vmatpush3.msra.mxu0 %v104_v8  ;;  %v73_v29 = vld [vmem:[#allocation2 + $0x60] sm:$0xff]  ;;  %v76_v30 = vld [vmem:[#allocation2 + $0x78] sm:$0xff]  ;;  %v75_v31 = vld [vmem:[#allocation2 + $0x70] sm:$0xff] }
  0x2f   :  { %904 = vmatpush3.msra.mxu1 %v96_v9  ;;  %865 = vmatprep.subr.mxu0 %v103_v10  ;;  %v78_v32 = vld [vmem:[#allocation2 + $0x88] sm:$0xff]  ;;  %v77_v33 = vld [vmem:[#allocation2 + $0x80] sm:$0xff]  ;;  %v80_v34 = vld [vmem:[#allocation2 + $0x98] sm:$0xff] }
  0x30   :  { %905 = vmatprep.subr.mxu1 %v95_v11  ;;  %866 = vmatpush3.msra.mxu0 %v103_v10  ;;  %v79_v35 = vld [vmem:[#allocation2 + $0x90] sm:$0xff]  ;;  %v82_v36 = vld [vmem:[#allocation2 + $0xa8] sm:$0xff]  ;;  %v81_v37 = vld [vmem:[#allocation2 + $0xa0] sm:$0xff] }
  0x31   :  { %906 = vmatpush3.msra.mxu1 %v95_v11  ;;  %867 = vmatprep.subr.mxu0 %v102_v12  ;;  %v84_v38 = vld [vmem:[#allocation2 + $0xb8] sm:$0xff]  ;;  %v83_v39 = vld [vmem:[#allocation2 + $0xb0] sm:$0xff]  ;;  %v86_v40 = vld [vmem:[#allocation2 + $0xc8] sm:$0xff] }
  0x32   :  { %907 = vmatprep.subr.mxu1 %v94_v13  ;;  %868 = vmatpush3.msra.mxu0 %v102_v12  ;;  %v85_v41 = vld [vmem:[#allocation2 + $0xc0] sm:$0xff]  ;;  %v88_v42 = vld [vmem:[#allocation2 + $0xd8] sm:$0xff]  ;;  %v87_v43 = vld [vmem:[#allocation2 + $0xd0] sm:$0xff] }
  0x33   :  { %908 = vmatpush3.msra.mxu1 %v94_v13  ;;  %869 = vmatprep.subr.mxu0 %v101_v14  ;;  %v90_v44 = vld [vmem:[#allocation2 + $0xe8] sm:$0xff]  ;;  %v89_v45 = vld [vmem:[#allocation2 + $0xe0] sm:$0xff]  ;;  %v92_v46 = vld [vmem:[#allocation2 + $0xf8] sm:$0xff] }
  0x34   :  { %909 = vmatprep.subr.mxu1 %v93_v15  ;;  %870 = vmatpush3.msra.mxu0 %v101_v14  ;;  %v91_v47 = vld [vmem:[#allocation2 + $0xf0] sm:$0xff] }
  0x35   :  { %871 = vmatprep.mubr.msk.f32.mxu0 %vm109_vm0, %v62_v16  ;;  %910 = vmatpush3.msra.mxu1 %v93_v15 }
  0x36   :  { %911 = vmatprep.mubr.msk.f32.mxu1 %vm109_vm0, %v61_v17  ;;  %872 = vmatmul.mubr.msk.f32.vlgmr.msra.gmra.mxu0 %vm109_vm0, %v64_v18 }
  0x37   :  { %912 = vmatmul.mubr.msk.f32.vlgmr.msra.gmra.mxu1 %vm109_vm0, %v63_v19  ;;  %874 = vmatprep.mubr.msk.f32.mxu0 %vm109_vm0, %v66_v20 }
  0x38   :  { %914 = vmatprep.mubr.msk.f32.mxu1 %vm109_vm0, %v65_v21 }
  0x3a   :  { %875 = vmatmul.mubr.msk.f32.gmra.mxu0 %vm109_vm0, %v68_v22 }
  0x3b   :  { %915 = vmatmul.mubr.msk.f32.gmra.mxu1 %vm109_vm0, %v67_v23  ;;  %877 = vmatprep.mubr.msk.f32.mxu0 %vm109_vm0, %v70_v24 }
  0x3c   :  { %917 = vmatprep.mubr.msk.f32.mxu1 %vm109_vm0, %v69_v25 }
  0x3e   :  { %878 = vmatmul.mubr.msk.f32.gmra.mxu0 %vm109_vm0, %v72_v26 }
  0x3f   :  { %918 = vmatmul.mubr.msk.f32.gmra.mxu1 %vm109_vm0, %v71_v27  ;;  %880 = vmatprep.mubr.msk.f32.mxu0 %vm109_vm0, %v74_v28 }
  0x40   :  { %920 = vmatprep.mubr.msk.f32.mxu1 %vm109_vm0, %v73_v29 }
  0x42   :  { %881 = vmatmul.mubr.msk.f32.gmra.mxu0 %vm109_vm0, %v76_v30 }
  0x43   :  { %921 = vmatmul.mubr.msk.f32.gmra.mxu1 %vm109_vm0, %v75_v31  ;;  %883 = vmatprep.mubr.msk.f32.mxu0 %vm109_vm0, %v78_v32 }
  0x44   :  { %923 = vmatprep.mubr.msk.f32.mxu1 %vm109_vm0, %v77_v33 }
  0x46   :  { %884 = vmatmul.mubr.msk.f32.gmra.mxu0 %vm109_vm0, %v80_v34 }
  0x47   :  { %924 = vmatmul.mubr.msk.f32.gmra.mxu1 %vm109_vm0, %v79_v35  ;;  %886 = vmatprep.mubr.msk.f32.mxu0 %vm109_vm0, %v82_v36 }
  0x48   :  { %926 = vmatprep.mubr.msk.f32.mxu1 %vm109_vm0, %v81_v37 }
  0x4a   :  { %887 = vmatmul.mubr.msk.f32.gmra.mxu0 %vm109_vm0, %v84_v38 }
  0x4b   :  { %927 = vmatmul.mubr.msk.f32.gmra.mxu1 %vm109_vm0, %v83_v39  ;;  %889 = vmatprep.mubr.msk.f32.mxu0 %vm109_vm0, %v86_v40 }
  0x4c   :  { %929 = vmatprep.mubr.msk.f32.mxu1 %vm109_vm0, %v85_v41 }
  0x4e   :  { %890 = vmatmul.mubr.msk.f32.gmra.mxu0 %vm109_vm0, %v88_v42 }
  0x4f   :  { %930 = vmatmul.mubr.msk.f32.gmra.mxu1 %vm109_vm0, %v87_v43  ;;  %892 = vmatprep.mubr.msk.f32.mxu0 %vm109_vm0, %v90_v44 }
  0x50   :  { %932 = vmatprep.mubr.msk.f32.mxu1 %vm109_vm0, %v89_v45 }
  0x52   :  { %893 = vmatmul.mubr.msk.f32.gmra.mxu0 %vm109_vm0, %v92_v46 }
  0x53   :  { %933 = vmatmul.mubr.msk.f32.gmra.mxu1 %vm109_vm0, %v91_v47 }
  0xf6   :  { %v873_v48 = vpop.f32.mrf.mxu0 }
  0xf7   :  { %v913_v49 = vpop.f32.mrf.mxu1 }
  0xf8   :  { %v1112_v50 = vadd.f32 %v913_v49, %v873_v48  ;;  %v224_v51 = vpop.f32.mrf.mxu0 }
  0xf9   :  { %v417_v52 = vpop.f32.mrf.mxu1 }
  0xfa   :  { %v1114_v53 = vadd.f32 %v417_v52, %v224_v51  ;;  %v499_v54 = vsel %vm109_vm0, %v1112_v50, 0.0  ;;  %v876_v55 = vpop.f32.mrf.mxu0 }
  0xfb   :  { %500 = vadd.xlane.f32.xlu0 %v499_v54  ;;  %v916_v56 = vpop.f32.mrf.mxu1 }
  0xfc   :  { %v1118_v57 = vadd.f32 %v916_v56, %v876_v55  ;;  %v234_v58 = vpop.f32.mrf.mxu0  ;;  %v496_v62 = vsel %vm109_vm0, %v1114_v53, 0.0 }
  0xfd   :  { %v427_v59 = vpop.f32.mrf.mxu1 }
  0xfe   :  { %v1120_v60 = vadd.f32 %v427_v59, %v234_v58  ;;  %v505_v61 = vsel %vm109_vm0, %v1118_v57, 0.0  ;;  %v879_v63 = vpop.f32.mrf.mxu0 }
  0xff   :  { %506 = vadd.xlane.f32.xlu1 %v505_v61  ;;  %v919_v0 = vpop.f32.mrf.mxu1  ;;  %497 = vadd.xlane.f32.xlu0 %v496_v62 }
 0x100   :  { %v244_v1 = vpop.f32.mrf.mxu0  ;;  %v1126_v3 = vadd.f32 %v919_v0, %v879_v63  ;;  %v502_v5 = vsel %vm109_vm0, %v1120_v60, 0.0 }
 0x101   :  { %v437_v2 = vpop.f32.mrf.mxu1 }
 0x102   :  { %v1128_v4 = vadd.f32 %v437_v2, %v244_v1  ;;  %v882_v6 = vpop.f32.mrf.mxu0  ;;  %v511_v13 = vsel %vm109_vm0, %v1126_v3, 0.0 }
 0x103   :  { %v922_v7 = vpop.f32.mrf.mxu1  ;;  %503 = vadd.xlane.f32.xlu1 %v502_v5 }
 0x104   :  { %v508_v8 = vsel %vm109_vm0, %v1128_v4, 0.0  ;;  %v254_v9 = vpop.f32.mrf.mxu0  ;;  %v1134_v11 = vadd.f32 %v922_v7, %v882_v6 }
 0x105   :  { %v447_v10 = vpop.f32.mrf.mxu1  ;;  %509 = vadd.xlane.f32.xlu0 %v508_v8 }
 0x106   :  { %v1136_v12 = vadd.f32 %v447_v10, %v254_v9  ;;  %v885_v14 = vpop.f32.mrf.mxu0  ;;  %v517_v21 = vsel %vm109_vm0, %v1134_v11, 0.0 }
 0x107   :  { %v925_v15 = vpop.f32.mrf.mxu1  ;;  %512 = vadd.xlane.f32.xlu1 %v511_v13 }
 0x108   :  { %v514_v16 = vsel %vm109_vm0, %v1136_v12, 0.0  ;;  %v264_v17 = vpop.f32.mrf.mxu0  ;;  %v1142_v19 = vadd.f32 %v925_v15, %v885_v14 }
 0x109   :  { %v457_v18 = vpop.f32.mrf.mxu1  ;;  %515 = vadd.xlane.f32.xlu0 %v514_v16 }
 0x10a   :  { %v1144_v20 = vadd.f32 %v457_v18, %v264_v17  ;;  %v888_v22 = vpop.f32.mrf.mxu0  ;;  %v523_v29 = vsel %vm109_vm0, %v1142_v19, 0.0 }
 0x10b   :  { %v928_v23 = vpop.f32.mrf.mxu1  ;;  %518 = vadd.xlane.f32.xlu1 %v517_v21 }
 0x10c   :  { %v520_v24 = vsel %vm109_vm0, %v1144_v20, 0.0  ;;  %v274_v25 = vpop.f32.mrf.mxu0  ;;  %v1150_v27 = vadd.f32 %v928_v23, %v888_v22 }
 0x10d   :  { %v467_v26 = vpop.f32.mrf.mxu1  ;;  %521 = vadd.xlane.f32.xlu0 %v520_v24 }
 0x10e   :  { %v1152_v28 = vadd.f32 %v467_v26, %v274_v25  ;;  %v891_v30 = vpop.f32.mrf.mxu0  ;;  %v529_v37 = vsel %vm109_vm0, %v1150_v27, 0.0 }
 0x10f   :  { %v931_v31 = vpop.f32.mrf.mxu1  ;;  %524 = vadd.xlane.f32.xlu1 %v523_v29 }
 0x110   :  { %v526_v32 = vsel %vm109_vm0, %v1152_v28, 0.0  ;;  %v284_v33 = vpop.f32.mrf.mxu0  ;;  %v1158_v35 = vadd.f32 %v931_v31, %v891_v30 }
 0x111   :  { %v477_v34 = vpop.f32.mrf.mxu1  ;;  %527 = vadd.xlane.f32.xlu0 %v526_v32 }
 0x112   :  { %v1160_v36 = vadd.f32 %v477_v34, %v284_v33  ;;  %v894_v38 = vpop.f32.mrf.mxu0  ;;  %v535_v45 = vsel %vm109_vm0, %v1158_v35, 0.0 }
 0x113   :  { %v934_v39 = vpop.f32.mrf.mxu1  ;;  %530 = vadd.xlane.f32.xlu1 %v529_v37 }
 0x114   :  { %v532_v40 = vsel %vm109_vm0, %v1160_v36, 0.0  ;;  %v294_v41 = vpop.f32.mrf.mxu0  ;;  %v1166_v43 = vadd.f32 %v934_v39, %v894_v38 }
 0x115   :  { %v487_v42 = vpop.f32.mrf.mxu1  ;;  %533 = vadd.xlane.f32.xlu0 %v532_v40 }
 0x116   :  { %v1168_v44 = vadd.f32 %v487_v42, %v294_v41  ;;  %v541_v47 = vsel %vm109_vm0, %v1166_v43, 0.0 }
 0x117   :  { %536 = vadd.xlane.f32.xlu1 %v535_v45 }
 0x118   :  { %v538_v46 = vsel %vm109_vm0, %v1168_v44, 0.0 }
 0x119   :  { %539 = vadd.xlane.f32.xlu0 %v538_v46 }
 0x11b   :  { %542 = vadd.xlane.f32.xlu1 %v541_v47 }
 0x184   :  { %v501_v48 = vpop.xlane.xlu0 %500 }
 0x185   :  { %v546_v49 = vmul.f32 0.015625, %v501_v48 }
 0x187   :  { %v1177_v51 = vsub.f32 %v1112_v50, %v546_v49 }
 0x188   :  { %v507_v52 = vpop.xlane.xlu1 %506  ;;  %v498_v54 = vpop.xlane.xlu0 %497 }
 0x189   :  { %v548_v55 = vmul.f32 0.015625, %v507_v52  ;;  %v545_v56 = vmul.f32 0.015625, %v498_v54  ;;  %v578_v58 = vmul.f32 %v1177_v51, %v1177_v51 }
 0x18b   :  { %v1182_v59 = vsub.f32 %v1118_v57, %v548_v55  ;;  %v1185_v61 = vsub.f32 %v1114_v53, %v545_v56  ;;  %v596_v62 = vsel %vm109_vm0, %v578_v58, 0.0 }
 0x18c   :  { %597 = vadd.xlane.f32.xlu1 %v596_v62  ;;  %v504_v63 = vpop.xlane.xlu1 %503 }
 0x18d   :  { %v547_v0 = vmul.f32 0.015625, %v504_v63  ;;  %v580_v50 = vmul.f32 %v1182_v59, %v1182_v59  ;;  %v577_v1 = vmul.f32 %v1185_v61, %v1185_v61 }
 0x18e   :  { %v510_v2 = vpop.xlane.xlu0 %509 }
 0x18f   :  { %v1193_v5 = vsub.f32 %v1120_v60, %v547_v0  ;;  %v549_v57 = vmul.f32 0.015625, %v510_v2  ;;  %v602_v6 = vsel %vm109_vm0, %v580_v50, 0.0  ;;  %v593_v53 = vsel %vm109_vm0, %v577_v1, 0.0 }
 0x190   :  { %603 = vadd.xlane.f32.xlu1 %v602_v6  ;;  %v513_v7 = vpop.xlane.xlu1 %512  ;;  %594 = vadd.xlane.f32.xlu0 %v593_v53 }
 0x191   :  { %v1198_v8 = vsub.f32 %v1128_v4, %v549_v57  ;;  %v550_v9 = vmul.f32 0.015625, %v513_v7  ;;  %v579_v10 = vmul.f32 %v1193_v5, %v1193_v5 }
 0x192   :  { %v516_v13 = vpop.xlane.xlu0 %515 }
 0x193   :  { %v1203_v14 = vsub.f32 %v1126_v3, %v550_v9  ;;  %v551_v60 = vmul.f32 0.015625, %v516_v13  ;;  %v599_v15 = vsel %vm109_vm0, %v579_v10, 0.0  ;;  %v581_v16 = vmul.f32 %v1198_v8, %v1198_v8 }
 0x194   :  { %v519_v17 = vpop.xlane.xlu1 %518  ;;  %600 = vadd.xlane.f32.xlu0 %v599_v15 }
 0x195   :  { %v1209_v18 = vsub.f32 %v1136_v12, %v551_v60  ;;  %v552_v4 = vmul.f32 0.015625, %v519_v17  ;;  %v582_v21 = vmul.f32 %v1203_v14, %v1203_v14  ;;  %v605_v23 = vsel %vm109_vm0, %v581_v16, 0.0 }
 0x196   :  { %v522_v22 = vpop.xlane.xlu0 %521 }
 0x197   :  { %v1215_v3 = vsub.f32 %v1134_v11, %v552_v4  ;;  %v553_v24 = vmul.f32 0.015625, %v522_v22  ;;  %v608_v25 = vsel %vm109_vm0, %v582_v21, 0.0  ;;  %v583_v26 = vmul.f32 %v1209_v18, %v1209_v18 }
 0x198   :  { %609 = vadd.xlane.f32.xlu1 %v608_v25  ;;  %v525_v29 = vpop.xlane.xlu1 %524  ;;  %606 = vadd.xlane.f32.xlu0 %v605_v23 }
 0x199   :  { %v1221_v12 = vsub.f32 %v1144_v20, %v553_v24  ;;  %v554_v30 = vmul.f32 0.015625, %v525_v29  ;;  %v584_v31 = vmul.f32 %v1215_v3, %v1215_v3  ;;  %v611_v11 = vsel %vm109_vm0, %v583_v26, 0.0 }
 0x19a   :  { %v528_v32 = vpop.xlane.xlu0 %527 }
 0x19b   :  { %v1227_v33 = vsub.f32 %v1142_v19, %v554_v30  ;;  %v555_v34 = vmul.f32 0.015625, %v528_v32  ;;  %v614_v37 = vsel %vm109_vm0, %v584_v31, 0.0  ;;  %v585_v38 = vmul.f32 %v1221_v12, %v1221_v12 }
 0x19c   :  { %615 = vadd.xlane.f32.xlu1 %v614_v37  ;;  %v531_v39 = vpop.xlane.xlu1 %530  ;;  %612 = vadd.xlane.f32.xlu0 %v611_v11 }
 0x19d   :  { %v1233_v20 = vsub.f32 %v1152_v28, %v555_v34  ;;  %v556_v40 = vmul.f32 0.015625, %v531_v39  ;;  %v586_v41 = vmul.f32 %v1227_v33, %v1227_v33  ;;  %v617_v19 = vsel %vm109_vm0, %v585_v38, 0.0  ;;  %v1275_v39 = vld [vmem:[%s1397_s3] ss:$0 sm:$0xff] }
 0x19e   :  { %v534_v42 = vpop.xlane.xlu0 %533 }
 0x19f   :  { %v1239_v45 = vsub.f32 %v1150_v27, %v556_v40  ;;  %v557_v46 = vmul.f32 0.015625, %v534_v42  ;;  %v620_v47 = vsel %vm109_vm0, %v586_v41, 0.0  ;;  %v587_v48 = vmul.f32 %v1233_v20, %v1233_v20 }
 0x1a0   :  { %621 = vadd.xlane.f32.xlu1 %v620_v47  ;;  %v537_v49 = vpop.xlane.xlu1 %536  ;;  %618 = vadd.xlane.f32.xlu0 %v617_v19  ;;  %v1281_v19 = vld [vmem:[%s1398_s4] ss:$0 sm:$0xff] }
 0x1a1   :  { %v1245_v28 = vsub.f32 %v1160_v36, %v557_v46  ;;  %v558_v52 = vmul.f32 0.015625, %v537_v49  ;;  %v588_v54 = vmul.f32 %v1239_v45, %v1239_v45  ;;  %v623_v27 = vsel %vm109_vm0, %v587_v48, 0.0 }
 0x1a2   :  { %v540_v55 = vpop.xlane.xlu0 %539 }
 0x1a3   :  { %v1251_v56 = vsub.f32 %v1158_v35, %v558_v52  ;;  %v559_v58 = vmul.f32 0.015625, %v540_v55  ;;  %v626_v62 = vsel %vm109_vm0, %v588_v54, 0.0  ;;  %v589_v63 = vmul.f32 %v1245_v28, %v1245_v28 }
 0x1a4   :  { %627 = vadd.xlane.f32.xlu1 %v626_v62  ;;  %v543_v0 = vpop.xlane.xlu1 %542  ;;  %624 = vadd.xlane.f32.xlu0 %v623_v27 }
 0x1a5   :  { %v1257_v36 = vsub.f32 %v1168_v44, %v559_v58  ;;  %v560_v50 = vmul.f32 0.015625, %v543_v0  ;;  %v590_v1 = vmul.f32 %v1251_v56, %v1251_v56  ;;  %v629_v57 = vsel %vm109_vm0, %v589_v63, 0.0 }
 0x1a7   :  { %v1262_v2 = vsub.f32 %v1166_v43, %v560_v50  ;;  %v632_v35 = vsel %vm109_vm0, %v590_v1, 0.0  ;;  %v591_v6 = vmul.f32 %v1257_v36, %v1257_v36 }
 0x1a8   :  { %633 = vadd.xlane.f32.xlu1 %v632_v35  ;;  %630 = vadd.xlane.f32.xlu0 %v629_v57 }
 0x1a9   :  { %v592_v44 = vmul.f32 %v1262_v2, %v1262_v2  ;;  %v635_v7 = vsel %vm109_vm0, %v591_v6, 0.0 }
 0x1ab   :  { %v638_v53 = vsel %vm109_vm0, %v592_v44, 0.0 }
 0x1ac   :  { %639 = vadd.xlane.f32.xlu1 %v638_v53  ;;  %636 = vadd.xlane.f32.xlu0 %v635_v7 }
 0x215   :  { %v598_v43 = vpop.xlane.xlu1 %597 }
 0x216   :  { %v642_v9 = vmul.f32 0.015625, %v598_v43 }
 0x218   :  { %v658_v10 = vadd.f32 1e-05, %v642_v9 }
 0x219   :  { %v604_v13 = vpop.xlane.xlu1 %603  ;;  %v595_v60 = vpop.xlane.xlu0 %594 }
 0x21a   :  { %940 = vrsqrt.f32 %v658_v10  ;;  %v644_v15 = vmul.f32 0.015625, %v604_v13  ;;  %v641_v16 = vmul.f32 0.015625, %v595_v60 }
 0x21c   :  { %v660_v17 = vadd.f32 1e-05, %v644_v15  ;;  %v657_v4 = vadd.f32 1e-05, %v641_v16 }
 0x21d   :  { %v601_v21 = vpop.xlane.xlu0 %600 }
 0x21e   :  { %942 = vrsqrt.f32 %v660_v17  ;;  %v643_v22 = vmul.f32 0.015625, %v601_v21 }
 0x21f   :  { %944 = vrsqrt.f32 %v657_v4 }
 0x220   :  { %v659_v23 = vadd.f32 1e-05, %v643_v22 }
 0x221   :  { %v610_v24 = vpop.xlane.xlu1 %609  ;;  %v607_v25 = vpop.xlane.xlu0 %606 }
 0x222   :  { %946 = vrsqrt.f32 %v659_v23  ;;  %v646_v26 = vmul.f32 0.015625, %v610_v24  ;;  %v645_v29 = vmul.f32 0.015625, %v607_v25 }
 0x224   :  { %v662_v30 = vadd.f32 1e-05, %v646_v26  ;;  %v661_v31 = vadd.f32 1e-05, %v645_v29 }
 0x225   :  { %v616_v32 = vpop.xlane.xlu1 %615  ;;  %v613_v11 = vpop.xlane.xlu0 %612 }
 0x226   :  { %948 = vrsqrt.f32 %v662_v30  ;;  %v648_v34 = vmul.f32 0.015625, %v616_v32  ;;  %v647_v37 = vmul.f32 0.015625, %v613_v11 }
 0x227   :  { %v941_v38 = vpop.eup %940  ;;  %950 = vrsqrt.f32 %v661_v31 }
 0x228   :  { %v690_v40 = vmul.f32 %v941_v38, %v1177_v51  ;;  %v664_v41 = vadd.f32 1e-05, %v648_v34  ;;  %v663_v42 = vadd.f32 1e-05, %v647_v37 }
 0x229   :  { %v622_v46 = vpop.xlane.xlu1 %621  ;;  %v619_v47 = vpop.xlane.xlu0 %618 }
 0x22a   :  { %v713_v48 = vmul.f32 %v1275_v39, %v690_v40  ;;  %952 = vrsqrt.f32 %v664_v41  ;;  %v650_v49 = vmul.f32 0.015625, %v622_v46  ;;  %v649_v52 = vmul.f32 0.015625, %v619_v47 }
 0x22b   :  { %v943_v54 = vpop.eup %942  ;;  %954 = vrsqrt.f32 %v663_v42 }
 0x22c   :  { %v945_v55 = vpop.eup %944  ;;  %v736_v27 = vadd.f32 %v1281_v19, %v713_v48  ;;  %v692_v51 = vmul.f32 %v943_v54, %v1182_v59  ;;  %v666_v58 = vadd.f32 1e-05, %v650_v49  ;;  %v665_v62 = vadd.f32 1e-05, %v649_v52 }
 0x22d   :  { %v689_v63 = vmul.f32 %v945_v55, %v1185_v61  ;;  %v628_v0 = vpop.xlane.xlu1 %627  ;;  %v625_v50 = vpop.xlane.xlu0 %624 }
 0x22e   :  { %752 = vst.msk [vmem:[%s1399_s5 + $0x8] sm:$0xff] %vm109_vm0, %v736_v27  ;;  %v715_v1 = vmul.f32 %v1275_v39, %v692_v51  ;;  %956 = vrsqrt.f32 %v666_v58  ;;  %v652_v35 = vmul.f32 0.015625, %v628_v0  ;;  %v651_v57 = vmul.f32 0.015625, %v625_v50 }
 0x22f   :  { %v947_v6 = vpop.eup %946  ;;  %v712_v44 = vmul.f32 %v1275_v39, %v689_v63  ;;  %958 = vrsqrt.f32 %v665_v62 }
 0x230   :  { %v738_v59 = vadd.f32 %v1281_v19, %v715_v1  ;;  %v691_v61 = vmul.f32 %v947_v6, %v1193_v5  ;;  %v668_v53 = vadd.f32 1e-05, %v652_v35  ;;  %v667_v7 = vadd.f32 1e-05, %v651_v57 }
 0x231   :  { %v735_v43 = vadd.f32 %v1281_v19, %v712_v44  ;;  %v634_v9 = vpop.xlane.xlu1 %633  ;;  %v631_v10 = vpop.xlane.xlu0 %630 }
 0x232   :  { %754 = vst.msk [vmem:[%s1399_s5 + $0x18] sm:$0xff] %vm109_vm0, %v738_v59  ;;  %v714_v13 = vmul.f32 %v1275_v39, %v691_v61  ;;  %960 = vrsqrt.f32 %v668_v53  ;;  %v654_v60 = vmul.f32 0.015625, %v634_v9  ;;  %v653_v15 = vmul.f32 0.015625, %v631_v10 }
 0x233   :  { %v949_v16 = vpop.eup %948  ;;  %751 = vst.msk [vmem:[%s1399_s5] sm:$0xff] %vm109_vm0, %v735_v43  ;;  %962 = vrsqrt.f32 %v667_v7 }
 0x234   :  { %v951_v5 = vpop.eup %950  ;;  %v737_v17 = vadd.f32 %v1281_v19, %v714_v13  ;;  %v694_v4 = vmul.f32 %v949_v16, %v1203_v14  ;;  %v670_v21 = vadd.f32 1e-05, %v654_v60  ;;  %v669_v22 = vadd.f32 1e-05, %v653_v15 }
 0x235   :  { %v693_v23 = vmul.f32 %v951_v5, %v1198_v8  ;;  %v640_v24 = vpop.xlane.xlu1 %639  ;;  %v637_v25 = vpop.xlane.xlu0 %636 }
 0x236   :  { %753 = vst.msk [vmem:[%s1399_s5 + $0x10] sm:$0xff] %vm109_vm0, %v737_v17  ;;  %v717_v26 = vmul.f32 %v1275_v39, %v694_v4  ;;  %964 = vrsqrt.f32 %v670_v21  ;;  %v656_v29 = vmul.f32 0.015625, %v640_v24  ;;  %v655_v30 = vmul.f32 0.015625, %v637_v25 }
 0x237   :  { %v953_v31 = vpop.eup %952  ;;  %v716_v32 = vmul.f32 %v1275_v39, %v693_v23  ;;  %966 = vrsqrt.f32 %v669_v22 }
 0x238   :  { %v955_v14 = vpop.eup %954  ;;  %v740_v11 = vadd.f32 %v1281_v19, %v717_v26  ;;  %v696_v8 = vmul.f32 %v953_v31, %v1215_v3  ;;  %v672_v34 = vadd.f32 1e-05, %v656_v29  ;;  %v671_v37 = vadd.f32 1e-05, %v655_v30 }
 0x239   :  { %v739_v38 = vadd.f32 %v1281_v19, %v716_v32  ;;  %v695_v40 = vmul.f32 %v955_v14, %v1209_v18 }
 0x23a   :  { %756 = vst.msk [vmem:[%s1399_s5 + $0x28] sm:$0xff] %vm109_vm0, %v740_v11  ;;  %v719_v41 = vmul.f32 %v1275_v39, %v696_v8  ;;  %968 = vrsqrt.f32 %v672_v34 }
 0x23b   :  { %v957_v42 = vpop.eup %956  ;;  %755 = vst.msk [vmem:[%s1399_s5 + $0x20] sm:$0xff] %vm109_vm0, %v739_v38  ;;  %v718_v3 = vmul.f32 %v1275_v39, %v695_v40  ;;  %970 = vrsqrt.f32 %v671_v37 }
 0x23c   :  { %v959_v46 = vpop.eup %958  ;;  %v742_v18 = vadd.f32 %v1281_v19, %v719_v41  ;;  %v698_v47 = vmul.f32 %v957_v42, %v1227_v33 }
 0x23d   :  { %v741_v48 = vadd.f32 %v1281_v19, %v718_v3  ;;  %v697_v49 = vmul.f32 %v959_v46, %v1221_v12 }
 0x23e   :  { %758 = vst.msk [vmem:[%s1399_s5 + $0x38] sm:$0xff] %vm109_vm0, %v742_v18  ;;  %v721_v52 = vmul.f32 %v1275_v39, %v698_v47 }
 0x23f   :  { %v961_v54 = vpop.eup %960  ;;  %757 = vst.msk [vmem:[%s1399_s5 + $0x30] sm:$0xff] %vm109_vm0, %v741_v48  ;;  %v720_v55 = vmul.f32 %v1275_v39, %v697_v49 }
 0x240   :  { %v963_v33 = vpop.eup %962  ;;  %v744_v27 = vadd.f32 %v1281_v19, %v721_v52  ;;  %v700_v12 = vmul.f32 %v961_v54, %v1239_v45 }
 0x241   :  { %v743_v51 = vadd.f32 %v1281_v19, %v720_v55  ;;  %v699_v58 = vmul.f32 %v963_v33, %v1233_v20 }
 0x242   :  { %760 = vst.msk [vmem:[%s1399_s5 + $0x48] sm:$0xff] %vm109_vm0, %v744_v27  ;;  %v723_v62 = vmul.f32 %v1275_v39, %v700_v12 }
 0x243   :  { %v965_v63 = vpop.eup %964  ;;  %759 = vst.msk [vmem:[%s1399_s5 + $0x40] sm:$0xff] %vm109_vm0, %v743_v51  ;;  %v722_v0 = vmul.f32 %v1275_v39, %v699_v58 }
 0x244   :  { %v967_v45 = vpop.eup %966  ;;  %v746_v50 = vadd.f32 %v1281_v19, %v723_v62  ;;  %v702_v20 = vmul.f32 %v965_v63, %v1251_v56 }
 0x245   :  { %v745_v1 = vadd.f32 %v1281_v19, %v722_v0  ;;  %v701_v35 = vmul.f32 %v967_v45, %v1245_v28 }
 0x246   :  { %762 = vst.msk [vmem:[%s1399_s5 + $0x58] sm:$0xff] %vm109_vm0, %v746_v50  ;;  %v725_v57 = vmul.f32 %v1275_v39, %v702_v20 }
 0x247   :  { %v969_v6 = vpop.eup %968  ;;  %761 = vst.msk [vmem:[%s1399_s5 + $0x50] sm:$0xff] %vm109_vm0, %v745_v1  ;;  %v724_v44 = vmul.f32 %v1275_v39, %v701_v35 }
 0x248   :  { %v971_v56 = vpop.eup %970  ;;  %v748_v59 = vadd.f32 %v1281_v19, %v725_v57  ;;  %v704_v28 = vmul.f32 %v969_v6, %v1262_v2 }
 0x249   :  { %v747_v61 = vadd.f32 %v1281_v19, %v724_v44  ;;  %v703_v53 = vmul.f32 %v971_v56, %v1257_v36 }
 0x24a   :  { %764 = vst.msk [vmem:[%s1399_s5 + $0x68] sm:$0xff] %vm109_vm0, %v748_v59  ;;  %v727_v7 = vmul.f32 %v1275_v39, %v704_v28 }
 0x24b   :  { %763 = vst.msk [vmem:[%s1399_s5 + $0x60] sm:$0xff] %vm109_vm0, %v747_v61  ;;  %v726_v43 = vmul.f32 %v1275_v39, %v703_v53 }
 0x24c   :  { %v750_v2 = vadd.f32 %v1281_v19, %v727_v7 }
 0x24d   :  { %v749_v9 = vadd.f32 %v1281_v19, %v726_v43 }
 0x24e   :  { %766 = vst.msk [vmem:[%s1399_s5 + $0x78] sm:$0xff] %vm109_vm0, %v750_v2 }
 0x24f   :  { %765 = vst.msk [vmem:[%s1399_s5 + $0x70] sm:$0xff] %vm109_vm0, %v749_v9 }
 0x250   :  { %771 = vsyncpa [#allocation3], 1 }
 0x251   :  { %772 = vsyncpa [#allocation5], 1 }

</bundles_post_ra>
